<compile_context>
chip_gen: v5e
topology: v5e:2x2
jax: 0.10.0
libtpu: 0.0.40
codegen_flags: <defaults>
</compile_context>

<pallas_src>
import functools
import math

import jax
import jax.numpy as jnp
from jax import lax
from jax.experimental import pallas as pl
from jax.experimental.pallas import tpu as pltpu

_PAD = 8  # leading/trailing slack rows in the flat slab (alignment + OOB-free taps)


# ----------------------------------------------------------------------------
# Kernel
# ----------------------------------------------------------------------------
def _upsample_kernel(x_ref, top_ref, bot_ref, w_ref, b_ref, o_ref, slab_ref,
                     *, TH, W, Cin, r):
    """Fused conv3x3(pad=1) + PixelShuffle(r) + ReLU for one (batch, row-tile).

    x_ref    : (1, TH, W, Cin)   VMEM  pipelined centre row tile
    top_ref  : (1, 1, W, Cin)    VMEM  pipelined halo row h0-1 (clamped at border)
    bot_ref  : (1, 1, W, Cin)    VMEM  pipelined halo row h0+TH (clamped at border)
    w_ref    : (9*Cin, Cout)     VMEM  im2col weights, out-channels pre-permuted
    b_ref    : (1, Cout)         VMEM  f32 bias, pre-permuted
    o_ref    : (1, TH, r, W, r*Cin) VMEM output tile (reshaped to NHWC by wrapper)
    slab_ref : (2*_PAD+(TH+2)*W, Cin) VMEM flat, W-wide, vertically padded slab
    """
    rC = r * Cin
    ti = pl.program_id(1)
    nt = pl.num_programs(1)
    dt = slab_ref.dtype

    # ---- assemble the flat, W-wide, vertically padded slab --------------------
    # slab rows [_PAD + k*W, _PAD + (k+1)*W) hold padded-input row k:
    #   k == 0    -> top halo (input row h0-1, zeros at the image border)
    #   1 .. TH   -> centre tile rows (single contiguous, aligned store)
    #   k == TH+1 -> bottom halo (input row h0+TH, zeros at the border)
    # No horizontal padding is stored; out-of-row taps are masked below.
    @pl.when(ti > 0)
    def _():
        slab_ref[_PAD:_PAD + W, :] = top_ref[0, 0]

    @pl.when(ti == 0)
    def _():
        slab_ref[_PAD:_PAD + W, :] = jnp.zeros((W, Cin), dt)

    slab_ref[_PAD + W:_PAD + W + TH * W, :] = x_ref[0].reshape(TH * W, Cin)

    @pl.when(ti < nt - 1)
    def _():
        slab_ref[_PAD + (TH + 1) * W:_PAD + (TH + 2) * W, :] = bot_ref[0, 0]

    @pl.when(ti == nt - 1)
    def _():
        slab_ref[_PAD + (TH + 1) * W:_PAD + (TH + 2) * W, :] = jnp.zeros((W, Cin), dt)

    # ---- 3x3 conv: 9 contiguous-window tap matmuls, fused bias/ReLU/shuffle ---
    # Tap (kh, kw) for output pixel p = h*W + w is slab row
    #   _PAD + kh*W + (kw-1) + p,  i.e. a contiguous TH*W-row window; the
    # out-of-row elements (w==0 for kw=0, w==W-1 for kw=2) are masked to zero.
    wcol = lax.broadcasted_iota(jnp.int32, (TH * W, 1), 0) % W
    keep = {0: wcol != 0, 2: wcol != (W - 1)}      # kw == 1 needs no mask

    for i in range(r):              # r small f32 accumulators, stored eagerly
        acc = jnp.zeros((TH * W, rC), jnp.float32)
        for kh in range(3):
            for kw in range(3):
                start = _PAD + kh * W + (kw - 1)
                tap = slab_ref[start:start + TH * W, :]
                if kw in keep:
                    tap = jnp.where(keep[kw], tap, jnp.zeros_like(tap))
                k = kh * 3 + kw
                acc = acc + jnp.dot(
                    tap, w_ref[k * Cin:(k + 1) * Cin, i * rC:(i + 1) * rC],
                    preferred_element_type=jnp.float32)
        y = jnp.maximum(acc + b_ref[0:1, i * rC:(i + 1) * rC], 0.0)
        # Pre-permuted (i, j, c) channel order => this store + the wrapper's free
        # row-major reshape realize PixelShuffle with no extra HBM pass.
        o_ref[0, :, i, :, :] = y.astype(o_ref.dtype).reshape(TH, W, rC)


# ----------------------------------------------------------------------------
# Host-side plumbing
# ----------------------------------------------------------------------------
def _prepare_params(w, b, r, compute_dtype):
    """Permute output channels from (c, i, j) to (i, j, c) and flatten the taps."""
    kh, kw, cin, cout = w.shape
    cb = cout // (r * r)
    wp = w.reshape(kh, kw, cin, cb, r, r).transpose(0, 1, 2, 4, 5, 3)
    wmat = wp.reshape(kh * kw * cin, cout).astype(compute_dtype)     # (9*Cin, Cout)
    brow = b.reshape(cb, r, r).transpose(1, 2, 0).reshape(1, cout).astype(jnp.float32)
    return wmat, brow


def _vmem_limits():
    """Generation-aware VMEM limit / tile-sweep budget (v7x-safe fallback)."""
    cap = 64 * 1024 * 1024
    try:
        cap = int(pltpu.get_tpu_info().vmem_capacity_bytes)
    except Exception:
        pass
    limit = min(cap * 3 // 4, 100 * 1024 * 1024)   # ~96 MiB v5e/v6e, ~48 MiB v7x
    budget = limit * 3 // 5
    return int(limit), int(budget)


def _vmem_estimate(th, W, Cin, r, itemsize):
    """Per-tile VMEM footprint incl. weights, bias, slab, f32 acc and live taps."""
    lane = lambda c: -(-c // 128) * 128
    sub = lambda s: -(-s // 8) * 8
    Cout, rC = Cin * r * r, r * Cin
    in_tile = 2 * th * sub(W) * lane(Cin) * itemsize            # double-buffered
    halos = 2 * 2 * sub(W) * lane(Cin) * itemsize               # 2 halo specs, x2 buf
    weights = 2 * sub(9 * Cin) * lane(Cout) * itemsize
    bias = 2 * sub(1) * lane(Cout) * 4
    slab = sub(2 * _PAD + (th + 2) * W) * lane(Cin) * itemsize
    out_tile = 2 * th * r * sub(W) * lane(rC) * itemsize        # double-buffered
    acc = sub(th * W) * lane(rC) * 4                            # one f32 chunk acc
    taps = 2 * sub(th * W) * lane(Cin) * itemsize               # live masked taps
    yi = sub(th * W) * lane(rC) * itemsize
    return in_tile + halos + weights + bias + slab + out_tile + acc + taps + yi


def upsample_block(x, w, b, up_scale, *, tile_rows=None, interpret=False):
    """x: (N, H, W, Cin); w: (3, 3, Cin, Cin*r^2); b: (Cin*r^2,) -> (N, H*r, W*r, Cin)."""
    N, H, W, Cin = x.shape
    r = int(up_scale)
    Cout = Cin * r * r
    rC = r * Cin
    assert w.shape == (3, 3, Cin, Cout), w.shape
    assert b.shape == (Cout,), b.shape

    vmem_limit, budget = _vmem_limits()
    if tile_rows is None:
        itemsize = jnp.dtype(x.dtype).itemsize
        divs = [d for d in range(1, H + 1) if H % d == 0]
        fitting = [d for d in divs if _vmem_estimate(d, W, Cin, r, itemsize) <= budget]
        tile_rows = max(fitting) if fitting else 1
        if N == 1:                                   # keep >= 2 grid steps (megacore)
            balanced = [d for d in (fitting or [1]) if H // d >= 2]
            if balanced:
                tile_rows = max(balanced)
    TH = int(tile_rows)
    assert H % TH == 0, (H, TH)
    nt = H // TH

    wmat, brow = _prepare_params(w, b, r, x.dtype)
    kernel = functools.partial(_upsample_kernel, TH=TH, W=W, Cin=Cin, r=r)
    slab_rows = 2 * _PAD + (TH + 2) * W

    grid_spec = pltpu.PrefetchScalarGridSpec(
        num_scalar_prefetch=0,
        grid=(N, nt),
        in_specs=[
            # centre row tile (auto-pipelined)
            pl.BlockSpec((1, TH, W, Cin), lambda n, t: (n, t, 0, 0)),
            # top halo row h0-1 (clamped at the border, zero-overridden in-kernel)
            pl.BlockSpec((1, 1, W, Cin),
                         lambda n, t: (n, jnp.maximum(t * TH - 1, 0), 0, 0)),
            # bottom halo row h0+TH (clamped, zero-overridden in-kernel)
            pl.BlockSpec((1, 1, W, Cin),
                         lambda n, t: (n, jnp.minimum(t * TH + TH, H - 1), 0, 0)),
            # resident weights / bias
            pl.BlockSpec((9 * Cin, Cout), lambda n, t: (0, 0)),
            pl.BlockSpec((1, Cout), lambda n, t: (0, 0)),
        ],
        out_specs=pl.BlockSpec((1, TH, r, W, rC), lambda n, t: (n, t, 0, 0, 0)),
        scratch_shapes=[pltpu.VMEM((slab_rows, Cin), x.dtype)],
    )

    out5 = pl.pallas_call(
        kernel,
        out_shape=jax.ShapeDtypeStruct((N, H, r, W, rC), x.dtype),
        grid_spec=grid_spec,
        compiler_params=pltpu.CompilerParams(
            dimension_semantics=("parallel", "parallel"),
            vmem_limit_bytes=vmem_limit),
        interpret=interpret,
    )(x, x, x, wmat, brow)

    # Free row-major reinterpretation: (N, H, r, W, r*Cin) -> (N, H*r, W*r, Cin).
    return out5.reshape(N, H * r, W * r, Cin)


# ----------------------------------------------------------------------------
# Demo
# ----------------------------------------------------------------------------
if __name__ == "__main__":
    key = jax.random.PRNGKey(0)
    N, H, W, Cin = 2, 16, 16, 4          # NHWC (PyTorch NCHW: [2, 4, 16, 16])
    r = 2                                # up_scale
    Cout = Cin * r * r

    kx, kw_, kb = jax.random.split(key, 3)
    x = jax.random.normal(kx, (N, H, W, Cin), jnp.float32)
    w = jax.random.normal(kw_, (3, 3, Cin, Cout), jnp.float32) / math.sqrt(9 * Cin)
    b = jax.random.normal(kb, (Cout,), jnp.float32) * 0.1

    # tile_rows=8 -> 2 row tiles per image, exercising the pipelined-halo path.
    fwd = jax.jit(functools.partial(upsample_block, up_scale=r, tile_rows=8))
    out = fwd(x, w, b)
    jax.block_until_ready(out)

    # Pure-JAX reference: conv3x3 'SAME' + PixelShuffle(r) + ReLU (PyTorch semantics).
    ref = lax.conv_general_dilated(
        x, w, (1, 1), "SAME", dimension_numbers=("NHWC", "HWIO", "NHWC")) + b
    ref = ref.reshape(N, H, W, Cin, r, r).transpose(0, 1, 4, 2, 5, 3)
    ref = ref.reshape(N, H * r, W * r, Cin)
    ref = jnp.maximum(ref, 0.0)

    assert out.shape == (N, H * r, W * r, Cin)
    assert out.dtype == x.dtype
    assert bool(jnp.all(jnp.isfinite(out)))
    max_err = float(jnp.max(jnp.abs(out - ref)))
    assert max_err < 1e-4, f"max abs err {max_err}"
    print("KERNEL_OK")
</pallas_src>

<mosaic_0001>
module attributes {stable_mosaic.version = 11 : i64} {
  func.func @_upsample_kernel(%arg0: i32, %arg1: i32, %arg2: memref<1x8x16x4xf32, #tpu.memory_space<vmem>>, %arg3: memref<1x1x16x4xf32, #tpu.memory_space<vmem>>, %arg4: memref<1x1x16x4xf32, #tpu.memory_space<vmem>>, %arg5: memref<36x16xf32, #tpu.memory_space<vmem>>, %arg6: memref<1x16xf32, #tpu.memory_space<vmem>>, %arg7: memref<1x8x2x16x8xf32, #tpu.memory_space<vmem>>, %arg8: memref<176x4xf32, #tpu.memory_space<vmem>>) attributes {dimension_semantics = [#tpu.dimension_semantics<parallel>, #tpu.dimension_semantics<parallel>], iteration_bounds = array<i64: 2, 2>, scalar_prefetch = 0 : i64, scratch_operands = 1 : i64, tpu.core_type = #tpu.core_type<tc>, window_params = [{transform_indices = @transform_0, window_bounds = array<i64: 1, 8, 16, 4>}, {transform_indices = @transform_1, window_bounds = array<i64: 1, 1, 16, 4>}, {transform_indices = @transform_2, window_bounds = array<i64: 1, 1, 16, 4>}, {pipeline_mode = #tpu.pipeline_mode<synchronous>, transform_indices = @transform_3, window_bounds = array<i64: 36, 16>}, {pipeline_mode = #tpu.pipeline_mode<synchronous>, transform_indices = @transform_4, window_bounds = array<i64: 1, 16>}, {transform_indices = @transform_5, window_bounds = array<i64: 1, 8, 2, 16, 8>}]} {
    %c0_i32 = arith.constant 0 : i32
    %0 = arith.cmpi sgt, %arg1, %c0_i32 : i32
    %1 = arith.extui %0 : i1 to i32
    %c0_i32_0 = arith.constant 0 : i32
    %2 = arith.cmpi ne, %1, %c0_i32_0 : i32
    scf.if %2 {
      %c0_120 = arith.constant 0 : index
      %c0_121 = arith.constant 0 : index
      %c0_122 = arith.constant 0 : index
      %c0_123 = arith.constant 0 : index
      %177 = vector.load %arg3[%c0_120, %c0_121, %c0_122, %c0_123] : memref<1x1x16x4xf32, #tpu.memory_space<vmem>>, vector<1x1x16x4xf32>
      %178 = vector.shape_cast %177 : vector<1x1x16x4xf32> to vector<16x4xf32>
      %c8_124 = arith.constant 8 : index
      %c0_125 = arith.constant 0 : index
      %179 = vector.load %arg8[%c8_124, %c0_125] : memref<176x4xf32, #tpu.memory_space<vmem>>, vector<16x4xf32>
      tpu.vector_store %arg8[%c8_124, %c0_125], %178 {strides = array<i32>} : memref<176x4xf32, #tpu.memory_space<vmem>>, vector<16x4xf32>,
    } else {
    }
    %c0_i32_1 = arith.constant 0 : i32
    %3 = arith.cmpi eq, %arg1, %c0_i32_1 : i32
    %4 = arith.extui %3 : i1 to i32
    %c0_i32_2 = arith.constant 0 : i32
    %5 = arith.cmpi ne, %4, %c0_i32_2 : i32
    scf.if %5 {
      %cst_120 = arith.constant 0.000000e+00 : f32
      %177 = vector.broadcast %cst_120 : f32 to vector<16x4xf32>
      %c8_121 = arith.constant 8 : index
      %c0_122 = arith.constant 0 : index
      %178 = vector.load %arg8[%c8_121, %c0_122] : memref<176x4xf32, #tpu.memory_space<vmem>>, vector<16x4xf32>
      tpu.vector_store %arg8[%c8_121, %c0_122], %177 {strides = array<i32>} : memref<176x4xf32, #tpu.memory_space<vmem>>, vector<16x4xf32>,
    } else {
    }
    %c0 = arith.constant 0 : index
    %c0_3 = arith.constant 0 : index
    %c0_4 = arith.constant 0 : index
    %c0_5 = arith.constant 0 : index
    %6 = vector.load %arg2[%c0, %c0_3, %c0_4, %c0_5] : memref<1x8x16x4xf32, #tpu.memory_space<vmem>>, vector<1x8x16x4xf32>
    %7 = vector.shape_cast %6 : vector<1x8x16x4xf32> to vector<8x16x4xf32>
    %8 = vector.shape_cast %7 : vector<8x16x4xf32> to vector<128x4xf32>
    %c24 = arith.constant 24 : index
    %c0_6 = arith.constant 0 : index
    %9 = vector.load %arg8[%c24, %c0_6] : memref<176x4xf32, #tpu.memory_space<vmem>>, vector<128x4xf32>
    tpu.vector_store %arg8[%c24, %c0_6], %8 {strides = array<i32>} : memref<176x4xf32, #tpu.memory_space<vmem>>, vector<128x4xf32>,
    %c1_i32 = arith.constant 1 : i32
    %10 = arith.cmpi slt, %arg1, %c1_i32 : i32
    %11 = arith.extui %10 : i1 to i32
    %c0_i32_7 = arith.constant 0 : i32
    %12 = arith.cmpi ne, %11, %c0_i32_7 : i32
    scf.if %12 {
      %c0_120 = arith.constant 0 : index
      %c0_121 = arith.constant 0 : index
      %c0_122 = arith.constant 0 : index
      %c0_123 = arith.constant 0 : index
      %177 = vector.load %arg4[%c0_120, %c0_121, %c0_122, %c0_123] : memref<1x1x16x4xf32, #tpu.memory_space<vmem>>, vector<1x1x16x4xf32>
      %178 = vector.shape_cast %177 : vector<1x1x16x4xf32> to vector<16x4xf32>
      %c152 = arith.constant 152 : index
      %c0_124 = arith.constant 0 : index
      %179 = vector.load %arg8[%c152, %c0_124] : memref<176x4xf32, #tpu.memory_space<vmem>>, vector<16x4xf32>
      tpu.vector_store %arg8[%c152, %c0_124], %178 {strides = array<i32>} : memref<176x4xf32, #tpu.memory_space<vmem>>, vector<16x4xf32>,
    } else {
    }
    %c1_i32_8 = arith.constant 1 : i32
    %13 = arith.cmpi eq, %arg1, %c1_i32_8 : i32
    %14 = arith.extui %13 : i1 to i32
    %c0_i32_9 = arith.constant 0 : i32
    %15 = arith.cmpi ne, %14, %c0_i32_9 : i32
    scf.if %15 {
      %cst_120 = arith.constant 0.000000e+00 : f32
      %177 = vector.broadcast %cst_120 : f32 to vector<16x4xf32>
      %c152 = arith.constant 152 : index
      %c0_121 = arith.constant 0 : index
      %178 = vector.load %arg8[%c152, %c0_121] : memref<176x4xf32, #tpu.memory_space<vmem>>, vector<16x4xf32>
      tpu.vector_store %arg8[%c152, %c0_121], %177 {strides = array<i32>} : memref<176x4xf32, #tpu.memory_space<vmem>>, vector<16x4xf32>,
    } else {
    }
    %16 = tpu.iota {dimensions = array<i32: 0>} : vector<128x1xi32>
    %c16_i32 = arith.constant 16 : i32
    %c0_i32_10 = arith.constant 0 : i32
    %17 = arith.cmpi eq, %c16_i32, %c0_i32_10 : i32
    %c1_i32_11 = arith.constant 1 : i32
    %18 = arith.select %17, %c1_i32_11, %c16_i32 : i32
    %19 = vector.broadcast %18 : i32 to vector<128x1xi32>
    %20 = arith.remsi %16, %19 : vector<128x1xi32>
    %c0_i32_12 = arith.constant 0 : i32
    %21 = vector.broadcast %c0_i32_12 : i32 to vector<128x1xi32>
    %22 = arith.cmpi ne, %20, %21 : vector<128x1xi32>
    %c0_i32_13 = arith.constant 0 : i32
    %23 = vector.broadcast %c0_i32_13 : i32 to vector<128x1xi32>
    %24 = arith.cmpi slt, %20, %23 : vector<128x1xi32>
    %c0_i32_14 = arith.constant 0 : i32
    %25 = arith.cmpi slt, %18, %c0_i32_14 : i32
    %26 = vector.broadcast %25 : i1 to vector<128x1xi1>
    %27 = vector.broadcast %26 : vector<128x1xi1> to vector<128x1xi1>
    %28 = arith.xori %24, %27 : vector<128x1xi1>
    %29 = arith.andi %28, %22 : vector<128x1xi1>
    %30 = vector.broadcast %18 : i32 to vector<128x1xi32>
    %31 = arith.addi %20, %30 : vector<128x1xi32>
    %32 = arith.select %29, %31, %20 : vector<128x1xi1>, vector<128x1xi32>
    %c0_i32_15 = arith.constant 0 : i32
    %33 = vector.broadcast %c0_i32_15 : i32 to vector<128x1xi32>
    %34 = arith.cmpi ne, %32, %33 : vector<128x1xi32>
    %c15_i32 = arith.constant 15 : i32
    %35 = vector.broadcast %c15_i32 : i32 to vector<128x1xi32>
    %36 = arith.cmpi ne, %32, %35 : vector<128x1xi32>
    %cst = arith.constant 0.000000e+00 : f32
    %37 = vector.broadcast %cst : f32 to vector<128x8xf32>
    %c7 = arith.constant 7 : index
    %c0_16 = arith.constant 0 : index
    %38 = vector.load %arg8[%c7, %c0_16] : memref<176x4xf32, #tpu.memory_space<vmem>>, vector<128x4xf32>
    %cst_17 = arith.constant 0.000000e+00 : f32
    %39 = vector.broadcast %cst_17 : f32 to vector<128x4xf32>
    %40 = vector.shape_cast %34 : vector<128x1xi1> to vector<128x1xi1>
    %41 = vector.broadcast %40 : vector<128x1xi1> to vector<128x4xi1>
    %42 = arith.select %41, %38, %39 : vector<128x4xi1>, vector<128x4xf32>
    %c0_18 = arith.constant 0 : index
    %c0_19 = arith.constant 0 : index
    %43 = vector.load %arg5[%c0_18, %c0_19] : memref<36x16xf32, #tpu.memory_space<vmem>>, vector<4x8xf32>
    %cst_20 = arith.constant dense<0.000000e+00> : vector<128x8xf32>
    %44 = tpu.matmul %42, %43, %cst_20 {dimension_numbers = #tpu.dot_dimension_numbers<[1], [0], [0], [1], [0, 0, 1, 1], [], []>} : vector<128x4xf32>, vector<4x8xf32>, vector<128x8xf32> -> vector<128x8xf32>
    %45 = arith.addf %37, %44 : vector<128x8xf32>
    %c8 = arith.constant 8 : index
    %c0_21 = arith.constant 0 : index
    %46 = vector.load %arg8[%c8, %c0_21] : memref<176x4xf32, #tpu.memory_space<vmem>>, vector<128x4xf32>
    %c4 = arith.constant 4 : index
    %c0_22 = arith.constant 0 : index
    %47 = vector.load %arg5[%c4, %c0_22] : memref<36x16xf32, #tpu.memory_space<vmem>>, vector<4x8xf32>
    %cst_23 = arith.constant dense<0.000000e+00> : vector<128x8xf32>
    %48 = tpu.matmul %46, %47, %cst_23 {dimension_numbers = #tpu.dot_dimension_numbers<[1], [0], [0], [1], [0, 0, 1, 1], [], []>} : vector<128x4xf32>, vector<4x8xf32>, vector<128x8xf32> -> vector<128x8xf32>
    %49 = arith.addf %45, %48 : vector<128x8xf32>
    %c9 = arith.constant 9 : index
    %c0_24 = arith.constant 0 : index
    %50 = vector.load %arg8[%c9, %c0_24] : memref<176x4xf32, #tpu.memory_space<vmem>>, vector<128x4xf32>
    %cst_25 = arith.constant 0.000000e+00 : f32
    %51 = vector.broadcast %cst_25 : f32 to vector<128x4xf32>
    %52 = vector.shape_cast %36 : vector<128x1xi1> to vector<128x1xi1>
    %53 = vector.broadcast %52 : vector<128x1xi1> to vector<128x4xi1>
    %54 = arith.select %53, %50, %51 : vector<128x4xi1>, vector<128x4xf32>
    %c8_26 = arith.constant 8 : index
    %c0_27 = arith.constant 0 : index
    %55 = vector.load %arg5[%c8_26, %c0_27] : memref<36x16xf32, #tpu.memory_space<vmem>>, vector<4x8xf32>
    %cst_28 = arith.constant dense<0.000000e+00> : vector<128x8xf32>
    %56 = tpu.matmul %54, %55, %cst_28 {dimension_numbers = #tpu.dot_dimension_numbers<[1], [0], [0], [1], [0, 0, 1, 1], [], []>} : vector<128x4xf32>, vector<4x8xf32>, vector<128x8xf32> -> vector<128x8xf32>
    %57 = arith.addf %49, %56 : vector<128x8xf32>
    %c23 = arith.constant 23 : index
    %c0_29 = arith.constant 0 : index
    %58 = vector.load %arg8[%c23, %c0_29] : memref<176x4xf32, #tpu.memory_space<vmem>>, vector<128x4xf32>
    %cst_30 = arith.constant 0.000000e+00 : f32
    %59 = vector.broadcast %cst_30 : f32 to vector<128x4xf32>
    %60 = vector.shape_cast %34 : vector<128x1xi1> to vector<128x1xi1>
    %61 = vector.broadcast %60 : vector<128x1xi1> to vector<128x4xi1>
    %62 = arith.select %61, %58, %59 : vector<128x4xi1>, vector<128x4xf32>
    %c12 = arith.constant 12 : index
    %c0_31 = arith.constant 0 : index
    %63 = vector.load %arg5[%c12, %c0_31] : memref<36x16xf32, #tpu.memory_space<vmem>>, vector<4x8xf32>
    %cst_32 = arith.constant dense<0.000000e+00> : vector<128x8xf32>
    %64 = tpu.matmul %62, %63, %cst_32 {dimension_numbers = #tpu.dot_dimension_numbers<[1], [0], [0], [1], [0, 0, 1, 1], [], []>} : vector<128x4xf32>, vector<4x8xf32>, vector<128x8xf32> -> vector<128x8xf32>
    %65 = arith.addf %57, %64 : vector<128x8xf32>
    %c24_33 = arith.constant 24 : index
    %c0_34 = arith.constant 0 : index
    %66 = vector.load %arg8[%c24_33, %c0_34] : memref<176x4xf32, #tpu.memory_space<vmem>>, vector<128x4xf32>
    %c16 = arith.constant 16 : index
    %c0_35 = arith.constant 0 : index
    %67 = vector.load %arg5[%c16, %c0_35] : memref<36x16xf32, #tpu.memory_space<vmem>>, vector<4x8xf32>
    %cst_36 = arith.constant dense<0.000000e+00> : vector<128x8xf32>
    %68 = tpu.matmul %66, %67, %cst_36 {dimension_numbers = #tpu.dot_dimension_numbers<[1], [0], [0], [1], [0, 0, 1, 1], [], []>} : vector<128x4xf32>, vector<4x8xf32>, vector<128x8xf32> -> vector<128x8xf32>
    %69 = arith.addf %65, %68 : vector<128x8xf32>
    %c25 = arith.constant 25 : index
    %c0_37 = arith.constant 0 : index
    %70 = vector.load %arg8[%c25, %c0_37] : memref<176x4xf32, #tpu.memory_space<vmem>>, vector<128x4xf32>
    %cst_38 = arith.constant 0.000000e+00 : f32
    %71 = vector.broadcast %cst_38 : f32 to vector<128x4xf32>
    %72 = vector.shape_cast %36 : vector<128x1xi1> to vector<128x1xi1>
    %73 = vector.broadcast %72 : vector<128x1xi1> to vector<128x4xi1>
    %74 = arith.select %73, %70, %71 : vector<128x4xi1>, vector<128x4xf32>
    %c20 = arith.constant 20 : index
    %c0_39 = arith.constant 0 : index
    %75 = vector.load %arg5[%c20, %c0_39] : memref<36x16xf32, #tpu.memory_space<vmem>>, vector<4x8xf32>
    %cst_40 = arith.constant dense<0.000000e+00> : vector<128x8xf32>
    %76 = tpu.matmul %74, %75, %cst_40 {dimension_numbers = #tpu.dot_dimension_numbers<[1], [0], [0], [1], [0, 0, 1, 1], [], []>} : vector<128x4xf32>, vector<4x8xf32>, vector<128x8xf32> -> vector<128x8xf32>
    %77 = arith.addf %69, %76 : vector<128x8xf32>
    %c39 = arith.constant 39 : index
    %c0_41 = arith.constant 0 : index
    %78 = vector.load %arg8[%c39, %c0_41] : memref<176x4xf32, #tpu.memory_space<vmem>>, vector<128x4xf32>
    %cst_42 = arith.constant 0.000000e+00 : f32
    %79 = vector.broadcast %cst_42 : f32 to vector<128x4xf32>
    %80 = vector.shape_cast %34 : vector<128x1xi1> to vector<128x1xi1>
    %81 = vector.broadcast %80 : vector<128x1xi1> to vector<128x4xi1>
    %82 = arith.select %81, %78, %79 : vector<128x4xi1>, vector<128x4xf32>
    %c24_43 = arith.constant 24 : index
    %c0_44 = arith.constant 0 : index
    %83 = vector.load %arg5[%c24_43, %c0_44] : memref<36x16xf32, #tpu.memory_space<vmem>>, vector<4x8xf32>
    %cst_45 = arith.constant dense<0.000000e+00> : vector<128x8xf32>
    %84 = tpu.matmul %82, %83, %cst_45 {dimension_numbers = #tpu.dot_dimension_numbers<[1], [0], [0], [1], [0, 0, 1, 1], [], []>} : vector<128x4xf32>, vector<4x8xf32>, vector<128x8xf32> -> vector<128x8xf32>
    %85 = arith.addf %77, %84 : vector<128x8xf32>
    %c40 = arith.constant 40 : index
    %c0_46 = arith.constant 0 : index
    %86 = vector.load %arg8[%c40, %c0_46] : memref<176x4xf32, #tpu.memory_space<vmem>>, vector<128x4xf32>
    %c28 = arith.constant 28 : index
    %c0_47 = arith.constant 0 : index
    %87 = vector.load %arg5[%c28, %c0_47] : memref<36x16xf32, #tpu.memory_space<vmem>>, vector<4x8xf32>
    %cst_48 = arith.constant dense<0.000000e+00> : vector<128x8xf32>
    %88 = tpu.matmul %86, %87, %cst_48 {dimension_numbers = #tpu.dot_dimension_numbers<[1], [0], [0], [1], [0, 0, 1, 1], [], []>} : vector<128x4xf32>, vector<4x8xf32>, vector<128x8xf32> -> vector<128x8xf32>
    %89 = arith.addf %85, %88 : vector<128x8xf32>
    %c41 = arith.constant 41 : index
    %c0_49 = arith.constant 0 : index
    %90 = vector.load %arg8[%c41, %c0_49] : memref<176x4xf32, #tpu.memory_space<vmem>>, vector<128x4xf32>
    %cst_50 = arith.constant 0.000000e+00 : f32
    %91 = vector.broadcast %cst_50 : f32 to vector<128x4xf32>
    %92 = vector.shape_cast %36 : vector<128x1xi1> to vector<128x1xi1>
    %93 = vector.broadcast %92 : vector<128x1xi1> to vector<128x4xi1>
    %94 = arith.select %93, %90, %91 : vector<128x4xi1>, vector<128x4xf32>
    %c32 = arith.constant 32 : index
    %c0_51 = arith.constant 0 : index
    %95 = vector.load %arg5[%c32, %c0_51] : memref<36x16xf32, #tpu.memory_space<vmem>>, vector<4x8xf32>
    %cst_52 = arith.constant dense<0.000000e+00> : vector<128x8xf32>
    %96 = tpu.matmul %94, %95, %cst_52 {dimension_numbers = #tpu.dot_dimension_numbers<[1], [0], [0], [1], [0, 0, 1, 1], [], []>} : vector<128x4xf32>, vector<4x8xf32>, vector<128x8xf32> -> vector<128x8xf32>
    %97 = arith.addf %89, %96 : vector<128x8xf32>
    %c0_53 = arith.constant 0 : index
    %c0_54 = arith.constant 0 : index
    %98 = vector.load %arg6[%c0_53, %c0_54] : memref<1x16xf32, #tpu.memory_space<vmem>>, vector<1x8xf32>
    %99 = vector.broadcast %98 : vector<1x8xf32> to vector<128x8xf32>
    %100 = arith.addf %97, %99 : vector<128x8xf32>
    %cst_55 = arith.constant 0.000000e+00 : f32
    %101 = vector.broadcast %cst_55 : f32 to vector<128x8xf32>
    %102 = arith.maximumf %100, %101 : vector<128x8xf32>
    %103 = vector.shape_cast %102 : vector<128x8xf32> to vector<8x16x8xf32>
    %c0_56 = arith.constant 0 : index
    %c0_57 = arith.constant 0 : index
    %c0_58 = arith.constant 0 : index
    %c0_59 = arith.constant 0 : index
    %c0_60 = arith.constant 0 : index
    %104 = vector.load %arg7[%c0_56, %c0_57, %c0_58, %c0_59, %c0_60] : memref<1x8x2x16x8xf32, #tpu.memory_space<vmem>>, vector<1x8x1x16x8xf32>
    %105 = vector.shape_cast %104 : vector<1x8x1x16x8xf32> to vector<8x16x8xf32>
    %106 = vector.shape_cast %103 : vector<8x16x8xf32> to vector<1x8x1x16x8xf32>
    tpu.vector_store %arg7[%c0_56, %c0_57, %c0_58, %c0_59, %c0_60], %106 {strides = array<i32>} : memref<1x8x2x16x8xf32, #tpu.memory_space<vmem>>, vector<1x8x1x16x8xf32>,
    %cst_61 = arith.constant 0.000000e+00 : f32
    %107 = vector.broadcast %cst_61 : f32 to vector<128x8xf32>
    %c7_62 = arith.constant 7 : index
    %c0_63 = arith.constant 0 : index
    %108 = vector.load %arg8[%c7_62, %c0_63] : memref<176x4xf32, #tpu.memory_space<vmem>>, vector<128x4xf32>
    %cst_64 = arith.constant 0.000000e+00 : f32
    %109 = vector.broadcast %cst_64 : f32 to vector<128x4xf32>
    %110 = vector.shape_cast %34 : vector<128x1xi1> to vector<128x1xi1>
    %111 = vector.broadcast %110 : vector<128x1xi1> to vector<128x4xi1>
    %112 = arith.select %111, %108, %109 : vector<128x4xi1>, vector<128x4xf32>
    %c0_65 = arith.constant 0 : index
    %c8_66 = arith.constant 8 : index
    %113 = vector.load %arg5[%c0_65, %c8_66] : memref<36x16xf32, #tpu.memory_space<vmem>>, vector<4x8xf32>
    %cst_67 = arith.constant dense<0.000000e+00> : vector<128x8xf32>
    %114 = tpu.matmul %112, %113, %cst_67 {dimension_numbers = #tpu.dot_dimension_numbers<[1], [0], [0], [1], [0, 0, 1, 1], [], []>} : vector<128x4xf32>, vector<4x8xf32>, vector<128x8xf32> -> vector<128x8xf32>
    %115 = arith.addf %107, %114 : vector<128x8xf32>
    %c8_68 = arith.constant 8 : index
    %c0_69 = arith.constant 0 : index
    %116 = vector.load %arg8[%c8_68, %c0_69] : memref<176x4xf32, #tpu.memory_space<vmem>>, vector<128x4xf32>
    %c4_70 = arith.constant 4 : index
    %c8_71 = arith.constant 8 : index
    %117 = vector.load %arg5[%c4_70, %c8_71] : memref<36x16xf32, #tpu.memory_space<vmem>>, vector<4x8xf32>
    %cst_72 = arith.constant dense<0.000000e+00> : vector<128x8xf32>
    %118 = tpu.matmul %116, %117, %cst_72 {dimension_numbers = #tpu.dot_dimension_numbers<[1], [0], [0], [1], [0, 0, 1, 1], [], []>} : vector<128x4xf32>, vector<4x8xf32>, vector<128x8xf32> -> vector<128x8xf32>
    %119 = arith.addf %115, %118 : vector<128x8xf32>
    %c9_73 = arith.constant 9 : index
    %c0_74 = arith.constant 0 : index
    %120 = vector.load %arg8[%c9_73, %c0_74] : memref<176x4xf32, #tpu.memory_space<vmem>>, vector<128x4xf32>
    %cst_75 = arith.constant 0.000000e+00 : f32
    %121 = vector.broadcast %cst_75 : f32 to vector<128x4xf32>
    %122 = vector.shape_cast %36 : vector<128x1xi1> to vector<128x1xi1>
    %123 = vector.broadcast %122 : vector<128x1xi1> to vector<128x4xi1>
    %124 = arith.select %123, %120, %121 : vector<128x4xi1>, vector<128x4xf32>
    %c8_76 = arith.constant 8 : index
    %c8_77 = arith.constant 8 : index
    %125 = vector.load %arg5[%c8_76, %c8_77] : memref<36x16xf32, #tpu.memory_space<vmem>>, vector<4x8xf32>
    %cst_78 = arith.constant dense<0.000000e+00> : vector<128x8xf32>
    %126 = tpu.matmul %124, %125, %cst_78 {dimension_numbers = #tpu.dot_dimension_numbers<[1], [0], [0], [1], [0, 0, 1, 1], [], []>} : vector<128x4xf32>, vector<4x8xf32>, vector<128x8xf32> -> vector<128x8xf32>
    %127 = arith.addf %119, %126 : vector<128x8xf32>
    %c23_79 = arith.constant 23 : index
    %c0_80 = arith.constant 0 : index
    %128 = vector.load %arg8[%c23_79, %c0_80] : memref<176x4xf32, #tpu.memory_space<vmem>>, vector<128x4xf32>
    %cst_81 = arith.constant 0.000000e+00 : f32
    %129 = vector.broadcast %cst_81 : f32 to vector<128x4xf32>
    %130 = vector.shape_cast %34 : vector<128x1xi1> to vector<128x1xi1>
    %131 = vector.broadcast %130 : vector<128x1xi1> to vector<128x4xi1>
    %132 = arith.select %131, %128, %129 : vector<128x4xi1>, vector<128x4xf32>
    %c12_82 = arith.constant 12 : index
    %c8_83 = arith.constant 8 : index
    %133 = vector.load %arg5[%c12_82, %c8_83] : memref<36x16xf32, #tpu.memory_space<vmem>>, vector<4x8xf32>
    %cst_84 = arith.constant dense<0.000000e+00> : vector<128x8xf32>
    %134 = tpu.matmul %132, %133, %cst_84 {dimension_numbers = #tpu.dot_dimension_numbers<[1], [0], [0], [1], [0, 0, 1, 1], [], []>} : vector<128x4xf32>, vector<4x8xf32>, vector<128x8xf32> -> vector<128x8xf32>
    %135 = arith.addf %127, %134 : vector<128x8xf32>
    %c24_85 = arith.constant 24 : index
    %c0_86 = arith.constant 0 : index
    %136 = vector.load %arg8[%c24_85, %c0_86] : memref<176x4xf32, #tpu.memory_space<vmem>>, vector<128x4xf32>
    %c16_87 = arith.constant 16 : index
    %c8_88 = arith.constant 8 : index
    %137 = vector.load %arg5[%c16_87, %c8_88] : memref<36x16xf32, #tpu.memory_space<vmem>>, vector<4x8xf32>
    %cst_89 = arith.constant dense<0.000000e+00> : vector<128x8xf32>
    %138 = tpu.matmul %136, %137, %cst_89 {dimension_numbers = #tpu.dot_dimension_numbers<[1], [0], [0], [1], [0, 0, 1, 1], [], []>} : vector<128x4xf32>, vector<4x8xf32>, vector<128x8xf32> -> vector<128x8xf32>
    %139 = arith.addf %135, %138 : vector<128x8xf32>
    %c25_90 = arith.constant 25 : index
    %c0_91 = arith.constant 0 : index
    %140 = vector.load %arg8[%c25_90, %c0_91] : memref<176x4xf32, #tpu.memory_space<vmem>>, vector<128x4xf32>
    %cst_92 = arith.constant 0.000000e+00 : f32
    %141 = vector.broadcast %cst_92 : f32 to vector<128x4xf32>
    %142 = vector.shape_cast %36 : vector<128x1xi1> to vector<128x1xi1>
    %143 = vector.broadcast %142 : vector<128x1xi1> to vector<128x4xi1>
    %144 = arith.select %143, %140, %141 : vector<128x4xi1>, vector<128x4xf32>
    %c20_93 = arith.constant 20 : index
    %c8_94 = arith.constant 8 : index
    %145 = vector.load %arg5[%c20_93, %c8_94] : memref<36x16xf32, #tpu.memory_space<vmem>>, vector<4x8xf32>
    %cst_95 = arith.constant dense<0.000000e+00> : vector<128x8xf32>
    %146 = tpu.matmul %144, %145, %cst_95 {dimension_numbers = #tpu.dot_dimension_numbers<[1], [0], [0], [1], [0, 0, 1, 1], [], []>} : vector<128x4xf32>, vector<4x8xf32>, vector<128x8xf32> -> vector<128x8xf32>
    %147 = arith.addf %139, %146 : vector<128x8xf32>
    %c39_96 = arith.constant 39 : index
    %c0_97 = arith.constant 0 : index
    %148 = vector.load %arg8[%c39_96, %c0_97] : memref<176x4xf32, #tpu.memory_space<vmem>>, vector<128x4xf32>
    %cst_98 = arith.constant 0.000000e+00 : f32
    %149 = vector.broadcast %cst_98 : f32 to vector<128x4xf32>
    %150 = vector.shape_cast %34 : vector<128x1xi1> to vector<128x1xi1>
    %151 = vector.broadcast %150 : vector<128x1xi1> to vector<128x4xi1>
    %152 = arith.select %151, %148, %149 : vector<128x4xi1>, vector<128x4xf32>
    %c24_99 = arith.constant 24 : index
    %c8_100 = arith.constant 8 : index
    %153 = vector.load %arg5[%c24_99, %c8_100] : memref<36x16xf32, #tpu.memory_space<vmem>>, vector<4x8xf32>
    %cst_101 = arith.constant dense<0.000000e+00> : vector<128x8xf32>
    %154 = tpu.matmul %152, %153, %cst_101 {dimension_numbers = #tpu.dot_dimension_numbers<[1], [0], [0], [1], [0, 0, 1, 1], [], []>} : vector<128x4xf32>, vector<4x8xf32>, vector<128x8xf32> -> vector<128x8xf32>
    %155 = arith.addf %147, %154 : vector<128x8xf32>
    %c40_102 = arith.constant 40 : index
    %c0_103 = arith.constant 0 : index
    %156 = vector.load %arg8[%c40_102, %c0_103] : memref<176x4xf32, #tpu.memory_space<vmem>>, vector<128x4xf32>
    %c28_104 = arith.constant 28 : index
    %c8_105 = arith.constant 8 : index
    %157 = vector.load %arg5[%c28_104, %c8_105] : memref<36x16xf32, #tpu.memory_space<vmem>>, vector<4x8xf32>
    %cst_106 = arith.constant dense<0.000000e+00> : vector<128x8xf32>
    %158 = tpu.matmul %156, %157, %cst_106 {dimension_numbers = #tpu.dot_dimension_numbers<[1], [0], [0], [1], [0, 0, 1, 1], [], []>} : vector<128x4xf32>, vector<4x8xf32>, vector<128x8xf32> -> vector<128x8xf32>
    %159 = arith.addf %155, %158 : vector<128x8xf32>
    %c41_107 = arith.constant 41 : index
    %c0_108 = arith.constant 0 : index
    %160 = vector.load %arg8[%c41_107, %c0_108] : memref<176x4xf32, #tpu.memory_space<vmem>>, vector<128x4xf32>
    %cst_109 = arith.constant 0.000000e+00 : f32
    %161 = vector.broadcast %cst_109 : f32 to vector<128x4xf32>
    %162 = vector.shape_cast %36 : vector<128x1xi1> to vector<128x1xi1>
    %163 = vector.broadcast %162 : vector<128x1xi1> to vector<128x4xi1>
    %164 = arith.select %163, %160, %161 : vector<128x4xi1>, vector<128x4xf32>
    %c32_110 = arith.constant 32 : index
    %c8_111 = arith.constant 8 : index
    %165 = vector.load %arg5[%c32_110, %c8_111] : memref<36x16xf32, #tpu.memory_space<vmem>>, vector<4x8xf32>
    %cst_112 = arith.constant dense<0.000000e+00> : vector<128x8xf32>
    %166 = tpu.matmul %164, %165, %cst_112 {dimension_numbers = #tpu.dot_dimension_numbers<[1], [0], [0], [1], [0, 0, 1, 1], [], []>} : vector<128x4xf32>, vector<4x8xf32>, vector<128x8xf32> -> vector<128x8xf32>
    %167 = arith.addf %159, %166 : vector<128x8xf32>
    %c0_113 = arith.constant 0 : index
    %c8_114 = arith.constant 8 : index
    %168 = vector.load %arg6[%c0_113, %c8_114] : memref<1x16xf32, #tpu.memory_space<vmem>>, vector<1x8xf32>
    %169 = vector.broadcast %168 : vector<1x8xf32> to vector<128x8xf32>
    %170 = arith.addf %167, %169 : vector<128x8xf32>
    %cst_115 = arith.constant 0.000000e+00 : f32
    %171 = vector.broadcast %cst_115 : f32 to vector<128x8xf32>
    %172 = arith.maximumf %170, %171 : vector<128x8xf32>
    %173 = vector.shape_cast %172 : vector<128x8xf32> to vector<8x16x8xf32>
    %c0_116 = arith.constant 0 : index
    %c0_117 = arith.constant 0 : index
    %c1 = arith.constant 1 : index
    %c0_118 = arith.constant 0 : index
    %c0_119 = arith.constant 0 : index
    %174 = vector.load %arg7[%c0_116, %c0_117, %c1, %c0_118, %c0_119] : memref<1x8x2x16x8xf32, #tpu.memory_space<vmem>>, vector<1x8x1x16x8xf32>
    %175 = vector.shape_cast %174 : vector<1x8x1x16x8xf32> to vector<8x16x8xf32>
    %176 = vector.shape_cast %173 : vector<8x16x8xf32> to vector<1x8x1x16x8xf32>
    tpu.vector_store %arg7[%c0_116, %c0_117, %c1, %c0_118, %c0_119], %176 {strides = array<i32>} : memref<1x8x2x16x8xf32, #tpu.memory_space<vmem>>, vector<1x8x1x16x8xf32>,
    return
  }
  func.func @transform_0(%arg0: i32, %arg1: i32) -> (i32, i32, i32, i32) {
    %c0_i32 = arith.constant 0 : i32
    %c0_i32_0 = arith.constant 0 : i32
    %c0_i32_1 = arith.constant 0 : i32
    return %arg0, %arg1, %c0_i32, %c0_i32_0 : i32, i32, i32, i32
  }
  func.func @transform_1(%arg0: i32, %arg1: i32) -> (i32, i32, i32, i32) {
    %c8_i32 = arith.constant 8 : i32
    %0 = arith.muli %arg1, %c8_i32 : i32
    %c1_i32 = arith.constant 1 : i32
    %1 = arith.subi %0, %c1_i32 : i32
    %c0_i32 = arith.constant 0 : i32
    %2 = arith.maxsi %1, %c0_i32 : i32
    %c0_i32_0 = arith.constant 0 : i32
    %c0_i32_1 = arith.constant 0 : i32
    %c0_i32_2 = arith.constant 0 : i32
    return %arg0, %2, %c0_i32_0, %c0_i32_1 : i32, i32, i32, i32
  }
  func.func @transform_2(%arg0: i32, %arg1: i32) -> (i32, i32, i32, i32) {
    %c8_i32 = arith.constant 8 : i32
    %0 = arith.muli %arg1, %c8_i32 : i32
    %c8_i32_0 = arith.constant 8 : i32
    %1 = arith.addi %0, %c8_i32_0 : i32
    %c15_i32 = arith.constant 15 : i32
    %2 = arith.minsi %1, %c15_i32 : i32
    %c0_i32 = arith.constant 0 : i32
    %c0_i32_1 = arith.constant 0 : i32
    %c0_i32_2 = arith.constant 0 : i32
    return %arg0, %2, %c0_i32, %c0_i32_1 : i32, i32, i32, i32
  }
  func.func @transform_3(%arg0: i32, %arg1: i32) -> (i32, i32) {
    %c0_i32 = arith.constant 0 : i32
    %c0_i32_0 = arith.constant 0 : i32
    %c0_i32_1 = arith.constant 0 : i32
    return %c0_i32, %c0_i32_0 : i32, i32
  }
  func.func @transform_4(%arg0: i32, %arg1: i32) -> (i32, i32) {
    %c0_i32 = arith.constant 0 : i32
    %c0_i32_0 = arith.constant 0 : i32
    %c0_i32_1 = arith.constant 0 : i32
    return %c0_i32, %c0_i32_0 : i32, i32
  }
  func.func @transform_5(%arg0: i32, %arg1: i32) -> (i32, i32, i32, i32, i32) {
    %c0_i32 = arith.constant 0 : i32
    %c0_i32_0 = arith.constant 0 : i32
    %c0_i32_1 = arith.constant 0 : i32
    %c0_i32_2 = arith.constant 0 : i32
    return %arg0, %arg1, %c0_i32, %c0_i32_0, %c0_i32_1 : i32, i32, i32, i32, i32
  }
}

</mosaic_0001>

<bundles_post_ra>
// kernel: upsample_block.1
= control target key start
LH: loop header
LB: loop body
LE: loop exit
PB: predicated region body
PF: predicated region fallthrough
CT: control target
= control target key end

     0   :  { %s4325_s18 = smov 0   ;;  %s4327_s19 = smov 0   ;;  %s5827_s0 = inlined_call_operand.vmem [shape: f32[2,16,16,4], index: 0, kind: input, shape index: {}, may-alias: {0,1,2}]   ;;  %s5828_s1 = inlined_call_operand.vmem [shape: f32[2,16,16,4], index: 1, kind: input, shape index: {}, may-alias: {0,1,2}]   ;;  %s5829_s2 = inlined_call_operand.vmem [shape: f32[2,16,16,4], index: 2, kind: input, shape index: {}, may-alias: {0,1,2}]   ;;  %s5830_s3 = inlined_call_operand.vmem [shape: f32[36,16], index: 3, kind: input, shape index: {}]   ;;  %s5831_s4 = inlined_call_operand.vmem [shape: f32[1,16], index: 4, kind: input, shape index: {}]   ;;  %s5832_s5 = inlined_call_operand.vmem [shape: f32[2,16,2,16,8], index: 5, kind: output, shape index: {}]  }
   0x1   :  { %5887 = sst [smem:[#allocation40_spill]] %s5827_s0  ;;  %s4329_s20 = smov 0  }
   0x2   :  { %s4331_s21 = smov 0   ;;  %s4333_s22 = smov 0  }
   0x3 LB: > { %5888 = sst [smem:[#allocation3_spill]] %s4286_s21  ;;  %s24_s23 = sadd.s32 1, %s4282_s20  ;;  %s4290_s22 = sphi %s4333_s22, %s15_s22   ;;  %s4286_s21 = sphi %s4331_s21, %s6029_s21   ;;  %s4282_s20 = sphi %s4329_s20, %s6031_s20   ;;  %s4278_s19 = sphi %s4327_s19, %s6027_s19   ;;  %s4274_s18 = sphi %s4325_s18, %s6030_s18  }
   0x4   : > { %s27_s24 = sadd.s32 1, %s4286_s21  ;;  %p25_p0 = scmp.ge.s32.totalorder %s24_s23, 2 }
   0x5   : > { %p3849_p1 = scmp.ge.s32.totalorder %s4290_s22, 1  ;;  %p273_p2 = scmp.lt.s32.totalorder %s4290_s22, 5 }
   0x6   : > { %s6033_s23 = smov (%p25_p0, %s24_s23), 0  ;;  %s6035_s24 = smov (!%p25_p0, %s27_s24), %s4286_s21 }
   0x7   : > { %5889 = sst [smem:[#allocation4_spill]] %s6033_s23  ;;  %p274_p3 = pnand %p3849_p1, %p273_p2 }
   0x8   : > { %p29_p4 = scmp.ge.s32.totalorder %s6035_s24, 2 }
   0x9   : > { %277 = sbr.rel (%p274_p3) target bundleno = 801 (0x321), region = 40 }
   0xa   : > { %s6037_s24 = smov (%p29_p4, %s6035_s24), 0 }
   0xb   : > { %5890 = sst [smem:[#allocation5_spill]] %s6037_s24 }
   0xe   : > { %s3850_s25 = sshll.u32 %s4274_s18, 3  ;;  %p338_p5 = scmp.lt.s32.totalorder %s4278_s19, 1 }
   0xf   : > { %p340_p6 = scmp.lt.s32.totalorder %s3850_s25, 15  ;;  %s3855_s26 = sadd.s32 4294967295, %s3850_s25 }
  0x10   : > { %s6039_s19 = smov (!%p338_p5, %s4278_s19), 1  ;;  %p350_p7 = scmp.gt.s32.totalorder %s3855_s26, 0 }
  0x11   : > { %s341_s27 = scalar_select %p340_p6, %s3850_s25, 15 }
  0x12   : > { %s3852_s28 = sshll.u32 %s6039_s19, 5  ;;  %p3856_p8 = scmp.lt.s32.totalorder %s3855_s26, 15 }
  0x13   : > { %s3851_s29 = sshll.u32 %s341_s27, 1  ;;  %s366_s6 = sadd.s32 8, %s3850_s25 }
  0x14   : > { %s344_s30 = sadd.s32 %s3852_s28, %s3851_s29  ;;  %p367_p9 = scmp.lt.s32.totalorder %s366_s6, 15 }
  0x15   : > { %s3853_s7 = sshll.u32 %s344_s30, 3  ;;  %s5891_s0 = sld [smem:[#allocation40_spill]] }
  0x16   : > { %s3872_s11 = sshll.u32 %s341_s27, 2  ;;  %s6041_s26 = smov (!%p350_p7, %s3855_s26), 0 }
  0x17   : > { %s6043_s6 = smov (!%p367_p9, %s366_s6), 15  ;;  %s6045_s26 = smov (!%p3856_p8, %s6041_s26), 15 }
  0x18   : > { %s6047_s6 = smov (!%p367_p9, %s6043_s6), 15  ;;  %s3861_s12 = sshll.u32 %s6045_s26, 1 }
  0x19   : > { %s3873_s13 = sshll.u32 %s6039_s19, 6  ;;  %s358_s14 = sadd.s32 %s3861_s12, %s3852_s28 }
  0x1a   : > { %s3868_s15 = sshll.u32 %s6047_s6, 1  ;;  %s3863_s16 = sshll.u32 %s358_s14, 3 }
  0x1b   : > { %s4361_s10 = scalar_lea.vmem %s5891_s0, %s3853_s7  ;;  %s375_s17 = sadd.s32 %s3868_s15, %s3852_s28 }
  0x1c   : > { %s360_s30 = scalar_lea.vmem %s5828_s1, %s3863_s16  ;;  %s3870_s24 = sshll.u32 %s375_s17, 3 }
  0x1d   : > { %s4369_s7 = scalar_lea.vmem %s5829_s2, %s3870_s24  ;;  %s389_s27 = sadd.s32 %s3873_s13, %s3872_s11 }
  0x1e   : > { %s3874_s9 = sshll.u32 %s389_s27, 3  ;;  %p3875_p10 = scmp.le.s32.totalorder %s4274_s18, 0 }
  0x1f   : > { %s4374_s19 = scalar_lea.vmem %s5832_s5, %s3874_s9 }
  0x20   : > { %396 = sbr.rel (%p3875_p10) target bundleno = 40 (0x28), region = 44 }
  0x25   : > { %v397_v0 = vld [vmem:[%s360_s30] sm:$0xff]  ;;  %vm399_vm0 = vcmask 31744   ;;  %v398_v1 = vld [vmem:[%s360_s30 + $0x8] sm:$0xff] }
  0x26   : > { %400 = vst.msk [vmem:[#allocation2 + $0x8] sm:$0xff] %vm399_vm0, %v397_v0 }
  0x27   : > { %401 = vst.msk [vmem:[#allocation2 + $0x10] sm:$0xff] %vm399_vm0, %v398_v1 }
  0x28 PF: > { %p3876_p11 = scmp.ne.s32.totalorder %s4274_s18, 0 }
  0x2a   : > { %405 = sbr.rel (%p3876_p11) target bundleno = 50 (0x32), region = 48 }
  0x2f   : > { %vm406_vm1 = vcmask 31744   ;;  %v4292_v2 = vmov 0.0  }
  0x30   : > { %407 = vst.msk [vmem:[#allocation2 + $0x8] sm:$0xff] %vm406_vm1, %v4292_v2 }
  0x31   : > { %408 = vst.msk [vmem:[#allocation2 + $0x10] sm:$0xff] %vm406_vm1, %v4292_v2 }
  0x32 PF: > { %v409_v3 = vld [vmem:[%s4361_s10] sm:$0xff]  ;;  %vm425_vm2 = vcmask 31744   ;;  %v410_v4 = vld [vmem:[%s4361_s10 + $0x8] sm:$0xff]  ;;  %v411_v5 = vld [vmem:[%s4361_s10 + $0x10] sm:$0xff]  ;;  %p3877_p12 = scmp.ge.s32.totalorder %s4274_s18, 1 }
  0x33   : > { %426 = vst.msk [vmem:[#allocation2 + $0x18] sm:$0xff] %vm425_vm2, %v409_v3  ;;  %v412_v6 = vld [vmem:[%s4361_s10 + $0x18] sm:$0xff]  ;;  %v413_v7 = vld [vmem:[%s4361_s10 + $0x20] sm:$0xff]  ;;  %v414_v8 = vld [vmem:[%s4361_s10 + $0x28] sm:$0xff] }
  0x34   : > { %427 = vst.msk [vmem:[#allocation2 + $0x20] sm:$0xff] %vm425_vm2, %v410_v4  ;;  %v415_v9 = vld [vmem:[%s4361_s10 + $0x30] sm:$0xff]  ;;  %v416_v10 = vld [vmem:[%s4361_s10 + $0x38] sm:$0xff]  ;;  %v417_v11 = vld [vmem:[%s4361_s10 + $0x40] sm:$0xff] }
  0x35   : > { %428 = vst.msk [vmem:[#allocation2 + $0x28] sm:$0xff] %vm425_vm2, %v411_v5  ;;  %v418_v12 = vld [vmem:[%s4361_s10 + $0x48] sm:$0xff]  ;;  %v419_v13 = vld [vmem:[%s4361_s10 + $0x50] sm:$0xff]  ;;  %v420_v14 = vld [vmem:[%s4361_s10 + $0x58] sm:$0xff] }
  0x36   : > { %429 = vst.msk [vmem:[#allocation2 + $0x30] sm:$0xff] %vm425_vm2, %v412_v6  ;;  %v421_v15 = vld [vmem:[%s4361_s10 + $0x60] sm:$0xff]  ;;  %v422_v16 = vld [vmem:[%s4361_s10 + $0x68] sm:$0xff]  ;;  %v423_v17 = vld [vmem:[%s4361_s10 + $0x70] sm:$0xff] }
  0x37   : > { %430 = vst.msk [vmem:[#allocation2 + $0x38] sm:$0xff] %vm425_vm2, %v413_v7  ;;  %v424_v18 = vld [vmem:[%s4361_s10 + $0x78] sm:$0xff] }
  0x38   : > { %431 = vst.msk [vmem:[#allocation2 + $0x40] sm:$0xff] %vm425_vm2, %v414_v8 }
  0x39   : > { %432 = vst.msk [vmem:[#allocation2 + $0x48] sm:$0xff] %vm425_vm2, %v415_v9 }
  0x3a   : > { %433 = vst.msk [vmem:[#allocation2 + $0x50] sm:$0xff] %vm425_vm2, %v416_v10 }
  0x3b   : > { %434 = vst.msk [vmem:[#allocation2 + $0x58] sm:$0xff] %vm425_vm2, %v417_v11 }
  0x3c   : > { %435 = vst.msk [vmem:[#allocation2 + $0x60] sm:$0xff] %vm425_vm2, %v418_v12 }
  0x3d   : > { %436 = vst.msk [vmem:[#allocation2 + $0x68] sm:$0xff] %vm425_vm2, %v419_v13 }
  0x3e   : > { %437 = vst.msk [vmem:[#allocation2 + $0x70] sm:$0xff] %vm425_vm2, %v420_v14  ;;  %445 = sbr.rel (%p3877_p12) target bundleno = 70 (0x46), region = 52 }
  0x3f   : > { %438 = vst.msk [vmem:[#allocation2 + $0x78] sm:$0xff] %vm425_vm2, %v421_v15 }
  0x40   : > { %439 = vst.msk [vmem:[#allocation2 + $0x80] sm:$0xff] %vm425_vm2, %v422_v16 }
  0x41   : > { %440 = vst.msk [vmem:[#allocation2 + $0x88] sm:$0xff] %vm425_vm2, %v423_v17 }
  0x42   : > { %441 = vst.msk [vmem:[#allocation2 + $0x90] sm:$0xff] %vm425_vm2, %v424_v18 }
  0x43   : > { %v446_v19 = vld [vmem:[%s4369_s7] sm:$0xff]  ;;  %v447_v20 = vld [vmem:[%s4369_s7 + $0x8] sm:$0xff] }
  0x44   : > { %448 = vst.msk [vmem:[#allocation2 + $0x98] sm:$0xff] %vm425_vm2, %v446_v19 }
  0x45   : > { %449 = vst.msk [vmem:[#allocation2 + $0xa0] sm:$0xff] %vm425_vm2, %v447_v20 }
  0x46 PF: > { %p3878_p13 = scmp.ne.s32.totalorder %s4274_s18, 1 }
  0x48   : > { %453 = sbr.rel (%p3878_p13) target bundleno = 80 (0x50), region = 56 }
  0x4d   : > { %v4293_v21 = vmov 0.0  }
  0x4e   : > { %454 = vst.msk [vmem:[#allocation2 + $0x98] sm:$0xff] %vm425_vm2, %v4293_v21 }
  0x4f   : > { %455 = vst.msk [vmem:[#allocation2 + $0xa0] sm:$0xff] %vm425_vm2, %v4293_v21 }
  0x50 PF: > { %v2269_v22 = vld [vmem:[%s5830_s3 + $0x4] sm:$0xf]  ;;  %vm5842_vm3 = vcmask 1043456   ;;  %v456_v24 = vlaneseq  ;;  %s4294_s26 = smov 120   ;;  %v4426_v25 = vld [vmem:[#allocation2 + $0x48] sm:$0xff]  ;;  %v5892_v34 = vmov 0 }
  0x51   : > { %v778_v23 = vld [vmem:[%s5830_s3 + $0x4] sm:$0xf]  ;;  %2271 = vrot.lane.b32.xlu0 %v2269_v22, %s4294_s26  ;;  %v761_v26 = vld [vmem:[%s5830_s3] sm:$0xf]  ;;  %v4436_v28 = vld [vmem:[#allocation2 + $0x8] sm:$0xff]  ;;  %v5895_v38 = vmov 0 }
  0x52   : > { %4205 = vmatpush.msk.msra.mxu2 %vm5842_vm3, %v778_v23  ;;  %4206 = vmatpush.msk.msra.mxu3 %vm5842_vm3, %v761_v26  ;;  %v4434_v27 = vshrl.u32 %v456_v24, 7  ;;  %v697_v31 = vld [vmem:[#allocation2 + $0x7] sm:$0xff]  ;;  %v4453_v36 = vld [vmem:[#allocation2 + $0x50] sm:$0xff]  ;;  %v4479_v46 = vld [vmem:[#allocation2 + $0x58] sm:$0xff]  ;;  %v5898_v50 = vmov 0  ;;  %v5900_v54 = vmov 0 }
  0x53   : > { %3888 = vmatmul.msk.f32.vlgmr.msra.gmra.mxu2 %vm425_vm2, %v4426_v25  ;;  %3879 = vmatpush.msk.msra.mxu0 %vm5842_vm3, %v778_v23  ;;  %v4444_v33 = vld [vmem:[#allocation2 + $0x47] sm:$0xff]  ;;  %v4466_v40 = vld [vmem:[#allocation2 + $0x10] sm:$0xff]  ;;  %v4484_v49 = vld [vmem:[#allocation2 + $0x18] sm:$0xff]  ;;  %v5905_v4 = vmov 0  ;;  %v5908_v6 = vmov 0  ;;  %v5914_v20 = vmov 0 }
  0x54   : > { %3896 = vmatpush.msk.msra.mxu1 %vm5842_vm3, %v761_v26  ;;  %v465_v29 = vadd.s32 64, %v4434_v27  ;;  %3880 = vmatmul.msk.f32.vlgmr.msra.gmra.mxu0 %vm425_vm2, %v4436_v28  ;;  %v477_v30 = vand.u32 15, %v4434_v27  ;;  %v1076_v35 = vld [vmem:[%s5830_s3 + $0x8] sm:$0xf]  ;;  %v459_v41 = vadd.s32 16, %v4434_v27  ;;  %v467_v43 = vadd.s32 80, %v4434_v27 }
  0x55   : > { %3913 = vmatpush.msk.msrb.mxu2 %vm5842_vm3, %v1076_v35  ;;  %v1241_v42 = vld [vmem:[%s5830_s3 + $0xc] sm:$0xf]  ;;  %v4494_v51 = vld [vmem:[#allocation2 + $0x17] sm:$0xff]  ;;  %v1390_v52 = vld [vmem:[%s5830_s3 + $0x10] sm:$0xf]  ;;  %v461_v60 = vadd.s32 32, %v4434_v27 }
  0x56   : > { %v533_v32 = vand.u32 15, %v465_v29  ;;  %vm4446_vm4 = vcmp.ne.s32.totalorder %v477_v30, 0  ;;  %3930 = vmatpush.msk.msrb.mxu3 %vm5842_vm3, %v1241_v42  ;;  %v698_v44 = vld [vmem:[#allocation2 + $0xf] sm:$0xff]  ;;  %v491_v45 = vand.u32 15, %v459_v41  ;;  %v547_v48 = vand.u32 15, %v467_v43  ;;  %3947 = vmatpush.msk.msrb.mxu0 %vm5842_vm3, %v1390_v52  ;;  %v4508_v55 = vld [vmem:[#allocation2 + $0x57] sm:$0xff] }
  0x57   : > { %v5893_v34 = vsel %vm4446_vm4, 4294967295, %v5892_v34  ;;  %v745_v37 = vsel %vm4446_vm4, %v697_v31, 0.0  ;;  %v4481_v47 = vld [vmem:[#allocation2 + $0x4f] sm:$0xff]  ;;  %v4515_v57 = vld [vmem:[#allocation2 + $0x60] sm:$0xff]  ;;  %v469_v61 = vadd.s32 96, %v4434_v27  ;;  %v505_v63 = vand.u32 15, %v461_v60 }
  0x58   : > { %5894 = vst [vmem:[#allocation6_spill] sm:$0xff] %v5893_v34  ;;  %vm4458_vm5 = vcmp.ne.s32.totalorder %v533_v32, 0  ;;  %3897 = vmatmul.msk.f32.vlgmr.msra.gmra.mxu1 %vm425_vm2, %v745_v37  ;;  %vm4490_vm6 = vcmp.ne.s32.totalorder %v491_v45, 0  ;;  %v1555_v53 = vld [vmem:[%s5830_s3 + $0x14] sm:$0xf]  ;;  %vm4504_vm7 = vcmp.ne.s32.totalorder %v547_v48, 0 }
  0x59   : > { %v5896_v38 = vsel %vm4458_vm5, 4294967295, %v5895_v38  ;;  %v753_v39 = vsel %vm4458_vm5, %v4444_v33, 0.0  ;;  %v5899_v50 = vsel %vm4490_vm6, 4294967295, %v5898_v50  ;;  %3964 = vmatpush.msk.msrb.mxu1 %vm5842_vm3, %v1555_v53  ;;  %v5901_v54 = vsel %vm4504_vm7, 4294967295, %v5900_v54  ;;  %5903 = vst [vmem:[#allocation9_spill] sm:$0xff] %v4515_v57  ;;  %v4521_v59 = vld [vmem:[#allocation2 + $0x20] sm:$0xff] }
  0x5a   : > { %5897 = vst [vmem:[#allocation7_spill] sm:$0xff] %v5896_v38  ;;  %3905 = vmatmul.msk.f32.vlgmr.msra.gmra.mxu3 %vm425_vm2, %v753_v39  ;;  %v747_v56 = vsel %vm4490_vm6, %v4494_v51, 0.0  ;;  %v755_v58 = vsel %vm4504_vm7, %v4508_v55, 0.0  ;;  %v4530_v62 = vld [vmem:[#allocation2 + $0x1f] sm:$0xff]  ;;  %v4532_v0 = vld [vmem:[#allocation2 + $0x68] sm:$0xff]  ;;  %v561_v2 = vand.u32 15, %v469_v61 }
  0x5b   : > { %3889 = vmatmul.msk.f32.gmra.mxu2 %vm425_vm2, %v4453_v36  ;;  %5902 = vst [vmem:[#allocation8_spill] sm:$0xff] %v5901_v54  ;;  %v4534_v1 = vld [vmem:[#allocation2 + $0x5f] sm:$0xff]  ;;  %v4538_v3 = vld [vmem:[#allocation2 + $0x28] sm:$0xff]  ;;  %vm4544_vm8 = vcmp.ne.s32.totalorder %v505_v63, 0  ;;  %v4561_v9 = vld [vmem:[#allocation2 + $0x70] sm:$0xff]  ;;  %v463_v12 = vadd.s32 48, %v4434_v27 }
  0x5c   : > { %3881 = vmatmul.msk.f32.gmra.mxu0 %vm425_vm2, %v4466_v40  ;;  %5904 = vst [vmem:[#allocation10_spill] sm:$0xff] %v4532_v0  ;;  %v5906_v4 = vsel %vm4544_vm8, 4294967295, %v5905_v4  ;;  %v4548_v5 = vld [vmem:[#allocation2 + $0x27] sm:$0xff]  ;;  %vm4550_vm9 = vcmp.ne.s32.totalorder %v561_v2, 0  ;;  %v4567_v11 = vld [vmem:[#allocation2 + $0x30] sm:$0xff]  ;;  %v471_v13 = vadd.s32 112, %v4434_v27 }
  0x5d   : > { %5907 = vst [vmem:[#allocation11_spill] sm:$0xff] %v5906_v4  ;;  %v5909_v6 = vsel %vm4550_vm9, 4294967295, %v5908_v6  ;;  %v4554_v7 = vld [vmem:[#allocation2 + $0x67] sm:$0xff]  ;;  %v749_v8 = vsel %vm4544_vm8, %v4548_v5, 0.0  ;;  %v4576_v14 = vld [vmem:[#allocation2 + $0x2f] sm:$0xff]  ;;  %v519_v15 = vand.u32 15, %v463_v12 }
  0x5e   : > { %5910 = vst [vmem:[#allocation12_spill] sm:$0xff] %v5909_v6  ;;  %v757_v10 = vsel %vm4550_vm9, %v4554_v7, 0.0  ;;  %v4578_v16 = vld [vmem:[#allocation2 + $0x78] sm:$0xff]  ;;  %v4580_v17 = vld [vmem:[#allocation2 + $0x6f] sm:$0xff]  ;;  %v575_v18 = vand.u32 15, %v471_v13  ;;  %v5917_v22 = vmov 0 }
  0x5f   : > { %5911 = vst [vmem:[#allocation13_spill] sm:$0xff] %v4561_v9  ;;  %v4584_v19 = vld [vmem:[#allocation2 + $0x38] sm:$0xff]  ;;  %vm4590_vm10 = vcmp.ne.s32.totalorder %v519_v15, 0  ;;  %v4607_v26 = vld [vmem:[#allocation2 + $0x80] sm:$0xff]  ;;  %v458_v31 = vadd.s32 8, %v4434_v27  ;;  %v1012_v37 = vld [vmem:[#allocation2 + $0x9] sm:$0xff] }
  0x60   : > { %3898 = vmatmul.msk.f32.gmra.mxu1 %vm425_vm2, %v698_v44  ;;  %5912 = vst [vmem:[#allocation14_spill] sm:$0xff] %v4578_v16  ;;  %v5915_v20 = vsel %vm4590_vm10, 4294967295, %v5914_v20  ;;  %v4594_v21 = vld [vmem:[#allocation2 + $0x37] sm:$0xff]  ;;  %vm4596_vm11 = vcmp.ne.s32.totalorder %v575_v18, 0  ;;  %v4613_v30 = vld [vmem:[#allocation2 + $0x40] sm:$0xff]  ;;  %v1225_v45 = vsel %vm4446_vm4, %v4494_v51, 0.0 }
  0x61   : > { %5913 = vst [vmem:[#allocation15_spill] sm:$0xff] %v4580_v17  ;;  %v5918_v22 = vsel %vm4596_vm11, 4294967295, %v5917_v22  ;;  %v4600_v23 = vld [vmem:[#allocation2 + $0x77] sm:$0xff]  ;;  %v751_v24 = vsel %vm4590_vm10, %v4594_v21, 0.0  ;;  %v4621_v32 = vld [vmem:[#allocation2 + $0x3f] sm:$0xff]  ;;  %v484_v39 = vand.u32 15, %v458_v31 }
  0x62   : > { %3906 = vmatmul.msk.f32.gmra.mxu3 %vm425_vm2, %v4481_v47  ;;  %5916 = vst [vmem:[#allocation16_spill] sm:$0xff] %v5915_v20  ;;  %v759_v29 = vsel %vm4596_vm11, %v4600_v23, 0.0  ;;  %v4623_v35 = vld [vmem:[#allocation2 + $0x7f] sm:$0xff]  ;;  %v1720_v41 = vld [vmem:[%s5830_s3 + $0x18] sm:$0xf]  ;;  %v460_v53 = vadd.s32 24, %v4434_v27 }
  0x63   : > { %3890 = vmatmul.msk.f32.gmra.mxu2 %vm425_vm2, %v4479_v46  ;;  %5919 = vst [vmem:[#allocation17_spill] sm:$0xff] %v5918_v22  ;;  %vm4634_vm12 = vcmp.ne.s32.totalorder %v484_v39, 15  ;;  %v1013_v43 = vld [vmem:[#allocation2 + $0x11] sm:$0xff]  ;;  %v1014_v48 = vld [vmem:[#allocation2 + $0x19] sm:$0xff]  ;;  %v2705_v12 = vld [vmem:[%s5830_s3 + $0xc] sm:$0xf] }
  0x64   : > { %3882 = vmatmul.msk.f32.gmra.mxu0 %vm425_vm2, %v4484_v49  ;;  %5920 = vst [vmem:[#allocation18_spill] sm:$0xff] %v4600_v23  ;;  %3981 = vmatpush.msk.msra.mxu2 %vm5842_vm3, %v1720_v41  ;;  %v1061_v44 = vsel %vm4634_vm12, %v1013_v43, 0.0  ;;  %v1869_v52 = vld [vmem:[%s5830_s3 + $0x1c] sm:$0xf]  ;;  %v2034_v60 = vld [vmem:[%s5830_s3 + $0x20] sm:$0xf] }
  0x65   : > { %5921 = vst [vmem:[#allocation19_spill] sm:$0xff] %v4607_v26  ;;  %3998 = vmatpush.msk.msra.mxu3 %vm5842_vm3, %v1869_v52  ;;  %4015 = vmatpush.msk.msra.mxu0 %vm5842_vm3, %v2034_v60  ;;  %v2252_v63 = vld [vmem:[%s5830_s3] sm:$0xf]  ;;  %v462_v13 = vadd.s32 40, %v4434_v27  ;;  %v4694_v15 = vld [vmem:[#allocation2 + $0x31] sm:$0xff]  ;;  %v464_v41 = vadd.s32 56, %v4434_v27 }
  0x66   : > { %5922 = vst [vmem:[#allocation20_spill] sm:$0xff] %v4623_v35  ;;  %2389 = vrot.lane.b32.xlu0 %v2252_v63, %s4294_s26  ;;  %v4719_v39 = vld [vmem:[#allocation2 + $0x39] sm:$0xff]  ;;  %v4726_v43 = vld [vmem:[#allocation2 + $0x41] sm:$0xff]  ;;  %v466_v60 = vadd.s32 72, %v4434_v27  ;;  %v4762_v63 = vld [vmem:[#allocation2 + $0x51] sm:$0xff] }
  0x67   : > { %v5331_v20 = vld [vmem:[#allocation2 + $0x39] sm:$0xff] }
  0x68   : > { %3899 = vmatmul.msk.f32.gmra.mxu1 %vm425_vm2, %v747_v56  ;;  %v1015_v56 = vld [vmem:[#allocation2 + $0x21] sm:$0xff] }
  0x69   : > { %v1540_v51 = vsel %vm4634_vm12, %v1015_v56, 0.0 }
  0x6a   : > { %3907 = vmatmul.msk.f32.gmra.mxu3 %vm425_vm2, %v755_v58  ;;  %v498_v58 = vand.u32 15, %v460_v53  ;;  %v2856_v53 = vld [vmem:[%s5830_s3 + $0x10] sm:$0xf] }
  0x6b   : > { %3891 = vmatmul.msk.f32.gmra.mxu2 %vm425_vm2, %v4515_v57  ;;  %2858 = vrot.lane.b32.xlu2 %v2856_v53, %s4294_s26 }
  0x6c   : > { %3883 = vmatmul.msk.f32.gmra.mxu0 %vm425_vm2, %v4521_v59  ;;  %vm4665_vm13 = vcmp.ne.s32.totalorder %v498_v58, 15  ;;  %v4754_v58 = vld [vmem:[#allocation2 + $0x49] sm:$0xff] }
  0x6d   : > { %v1063_v2 = vsel %vm4665_vm13, %v1015_v56, 0.0  ;;  %v1542_v18 = vsel %vm4665_vm13, %v4694_v15, 0.0 }
  0x70   : > { %3900 = vmatmul.msk.f32.gmra.mxu1 %vm425_vm2, %v4530_v62 }
  0x72   : > { %3908 = vmatmul.msk.f32.gmra.mxu3 %vm425_vm2, %v4534_v1 }
  0x73   : > { %3892 = vmatmul.msk.f32.gmra.mxu2 %vm425_vm2, %v4532_v0 }
  0x74   : > { %3884 = vmatmul.msk.f32.gmra.mxu0 %vm425_vm2, %v4538_v3 }
  0x78   : > { %3901 = vmatmul.msk.f32.gmra.mxu1 %vm425_vm2, %v749_v8  ;;  %v1227_v8 = vsel %vm4490_vm6, %v4548_v5, 0.0 }
  0x7a   : > { %3909 = vmatmul.msk.f32.gmra.mxu3 %vm425_vm2, %v757_v10  ;;  %v4684_v10 = vld [vmem:[#allocation2 + $0x29] sm:$0xff] }
  0x7b   : > { %3893 = vmatmul.msk.f32.gmra.mxu2 %vm425_vm2, %v4561_v9 }
  0x7c   : > { %3885 = vmatmul.msk.f32.gmra.mxu0 %vm425_vm2, %v4567_v11 }
  0x80   : > { %3902 = vmatmul.msk.f32.gmra.mxu1 %vm425_vm2, %v4576_v14 }
  0x82   : > { %3910 = vmatmul.msk.f32.gmra.mxu3 %vm425_vm2, %v4580_v17 }
  0x83   : > { %3894 = vmatmul.msk.f32.gmra.mxu2 %vm425_vm2, %v4578_v16 }
  0x84   : > { %3886 = vmatmul.msk.f32.gmra.mxu0 %vm425_vm2, %v4584_v19 }
  0x88   : > { %3903 = vmatmul.msk.f32.gmra.mxu1 %vm425_vm2, %v751_v24  ;;  %v512_v24 = vand.u32 15, %v462_v13 }
  0x8a   : > { %3911 = vmatmul.msk.f32.gmra.mxu3 %vm425_vm2, %v759_v29  ;;  %vm4707_vm14 = vcmp.ne.s32.totalorder %v512_v24, 15  ;;  %v5927_v29 = vmov 0 }
  0x8b   : > { %3895 = vmatmul.msk.f32.gmra.mxu2 %vm425_vm2, %v4607_v26  ;;  %v5928_v29 = vsel %vm4707_vm14, 4294967295, %v5927_v29  ;;  %v1065_v31 = vsel %vm4707_vm14, %v4694_v15, 0.0 }
  0x8c   : > { %3887 = vmatmul.msk.f32.gmra.mxu0 %vm425_vm2, %v4613_v30  ;;  %5929 = vst [vmem:[#allocation21_spill] sm:$0xff] %v5928_v29 }
  0x90   : > { %3904 = vmatmul.msk.f32.gmra.mxu1 %vm425_vm2, %v4621_v32 }
  0x92   : > { %3912 = vmatmul.msk.f32.gmra.mxu3 %vm425_vm2, %v4623_v35 }
  0x93   : > { %3914 = vmatmul.msk.f32.vlgmr.msrb.gmra.mxu2 %vm425_vm2, %v1012_v37  ;;  %v1229_v37 = vsel %vm4544_vm8, %v4594_v21, 0.0 }
  0x94   : > { %3948 = vmatmul.msk.f32.vlgmr.msrb.gmra.mxu0 %vm425_vm2, %v4484_v49 }
  0x98   : > { %3965 = vmatmul.msk.f32.vlgmr.msrb.gmra.mxu1 %vm425_vm2, %v1014_v48 }
  0x9a   : > { %3931 = vmatmul.msk.f32.vlgmr.msrb.gmra.mxu3 %vm425_vm2, %v1225_v45  ;;  %v526_v45 = vand.u32 15, %v464_v41 }
  0x9b   : > { %3915 = vmatmul.msk.f32.gmra.mxu2 %vm425_vm2, %v1061_v44  ;;  %v1544_v44 = vsel %vm4707_vm14, %v4726_v43, 0.0 }
  0x9c   : > { %3949 = vmatmul.msk.f32.gmra.mxu0 %vm425_vm2, %v4521_v59  ;;  %vm4739_vm15 = vcmp.ne.s32.totalorder %v526_v45, 15  ;;  %v4799_v45 = vld [vmem:[#allocation2 + $0x61] sm:$0xff] }
  0x9d   : > { %v1067_v56 = vsel %vm4739_vm15, %v4726_v43, 0.0 }
  0xa0   : > { %3966 = vmatmul.msk.f32.gmra.mxu1 %vm425_vm2, %v1540_v51  ;;  %v1231_v51 = vsel %vm4590_vm10, %v4444_v33, 0.0 }
  0xa2   : > { %3932 = vmatmul.msk.f32.gmra.mxu3 %vm425_vm2, %v4530_v62  ;;  %v2538_v62 = vld [vmem:[%s5830_s3 + $0x8] sm:$0xf] }
  0xa3   : > { %3916 = vmatmul.msk.f32.gmra.mxu2 %vm425_vm2, %v1014_v48  ;;  %2540 = vrot.lane.b32.xlu1 %v2538_v62, %s4294_s26  ;;  %v1546_v62 = vsel %vm4739_vm15, %v4762_v63, 0.0 }
  0xa4   : > { %3950 = vmatmul.msk.f32.gmra.mxu0 %vm425_vm2, %v4538_v3 }
  0xa8   : > { %3967 = vmatmul.msk.f32.gmra.mxu1 %vm425_vm2, %v4684_v10 }
  0xaa   : > { %3933 = vmatmul.msk.f32.gmra.mxu3 %vm425_vm2, %v1227_v8 }
  0xab   : > { %3917 = vmatmul.msk.f32.gmra.mxu2 %vm425_vm2, %v1063_v2  ;;  %2707 = vrot.lane.b32.xlu1 %v2705_v12, %s4294_s26  ;;  %v540_v2 = vand.u32 15, %v466_v60  ;;  %v5932_v12 = vmov 0 }
  0xac   : > { %3951 = vmatmul.msk.f32.gmra.mxu0 %vm425_vm2, %v4567_v11 }
  0xad   : > { %vm4776_vm0 = vcmp.ne.s32.totalorder %v540_v2, 15 }
  0xae   : > { %v5933_v12 = vsel %vm4776_vm0, 4294967295, %v5932_v12  ;;  %v1069_v24 = vsel %vm4776_vm0, %v4762_v63, 0.0 }
  0xaf   : > { %5934 = vst [vmem:[#allocation22_spill] sm:$0xff] %v5933_v12  ;;  %v4833_v12 = vld [vmem:[#allocation2 + $0x69] sm:$0xff] }
  0xb0   : > { %3968 = vmatmul.msk.f32.gmra.mxu1 %vm425_vm2, %v1542_v18 }
  0xb2   : > { %3934 = vmatmul.msk.f32.gmra.mxu3 %vm425_vm2, %v4576_v14 }
  0xb3   : > { %3918 = vmatmul.msk.f32.gmra.mxu2 %vm425_vm2, %v4684_v10 }
  0xb4   : > { %3952 = vmatmul.msk.f32.gmra.mxu0 %vm425_vm2, %v4584_v19 }
  0xb8   : > { %3969 = vmatmul.msk.f32.gmra.mxu1 %vm425_vm2, %v4719_v39 }
  0xba   : > { %3935 = vmatmul.msk.f32.gmra.mxu3 %vm425_vm2, %v1229_v37  ;;  %v4790_v37 = vld [vmem:[#allocation2 + $0x59] sm:$0xff] }
  0xbb   : > { %3919 = vmatmul.msk.f32.gmra.mxu2 %vm425_vm2, %v1065_v31  ;;  %v1233_v31 = vsel %vm4458_vm5, %v4508_v55, 0.0 }
  0xbc   : > { %3953 = vmatmul.msk.f32.gmra.mxu0 %vm425_vm2, %v4613_v30 }
  0xc0   : > { %3970 = vmatmul.msk.f32.gmra.mxu1 %vm425_vm2, %v1544_v44  ;;  %v468_v44 = vadd.s32 88, %v4434_v27 }
  0xc2   : > { %3936 = vmatmul.msk.f32.gmra.mxu3 %vm425_vm2, %v4621_v32 }
  0xc3   : > { %3920 = vmatmul.msk.f32.gmra.mxu2 %vm425_vm2, %v4719_v39  ;;  %v2272_v48 = vpop.permute.xlu0 %2271 }
  0xc4   : > { %4032 = vmatpush.msk.msra.mxu1 %vm5842_vm3, %v2272_v48  ;;  %3954 = vmatmul.msk.f32.gmra.mxu0 %vm425_vm2, %v4426_v25 }
  0xc8   : > { %3971 = vmatmul.msk.f32.gmra.mxu1 %vm425_vm2, %v4754_v58 }
  0xca   : > { %3937 = vmatmul.msk.f32.gmra.mxu3 %vm425_vm2, %v1231_v51 }
  0xcb   : > { %3921 = vmatmul.msk.f32.gmra.mxu2 %vm425_vm2, %v1067_v56  ;;  %v1548_v56 = vsel %vm4776_vm0, %v4799_v45, 0.0 }
  0xcc   : > { %3955 = vmatmul.msk.f32.gmra.mxu0 %vm425_vm2, %v4453_v36 }
  0xd0   : > { %3972 = vmatmul.msk.f32.gmra.mxu1 %vm425_vm2, %v1546_v62  ;;  %v554_v62 = vand.u32 15, %v468_v44 }
  0xd1   : > { %v4770_v8 = vpop.f32.mrf.mxu0 }
  0xd2   : > { %3938 = vmatmul.msk.f32.gmra.mxu3 %vm425_vm2, %v4481_v47  ;;  %vm4817_vm1 = vcmp.ne.s32.totalorder %v554_v62, 15  ;;  %v1235_v62 = vsel %vm4504_vm7, %v4554_v7, 0.0 }
  0xd3   : > { %3922 = vmatmul.msk.f32.gmra.mxu2 %vm425_vm2, %v4754_v58 }
  0xd4   : > { %3956 = vmatmul.msk.f32.gmra.mxu0 %vm425_vm2, %v4479_v46 }
  0xd5   : > { %v4782_v18 = vpop.f32.mrf.mxu1 }
  0xd6   : > { %v872_v13 = vpop.f32.mrf.mxu2 }
  0xd8   : > { %3973 = vmatmul.msk.f32.gmra.mxu1 %vm425_vm2, %v4790_v37 }
  0xd9   : > { %v4794_v41 = vpop.f32.mrf.mxu0 }
  0xda   : > { %3939 = vmatmul.msk.f32.gmra.mxu3 %vm425_vm2, %v1233_v31 }
  0xdb   : > { %3923 = vmatmul.msk.f32.gmra.mxu2 %vm425_vm2, %v1069_v24  ;;  %v5936_v24 = vmov 0 }
  0xdc   : > { %3957 = vmatmul.msk.f32.gmra.mxu0 %vm425_vm2, %v4515_v57  ;;  %v5937_v24 = vsel %vm4817_vm1, 4294967295, %v5936_v24 }
  0xdd   : > { %v988_v53 = vpop.f32.mrf.mxu3  ;;  %v4808_v60 = vpop.f32.mrf.mxu1  ;;  %5938 = vst [vmem:[#allocation24_spill] sm:$0xff] %v5937_v24 }
  0xde   : > { %v875_v48 = vpop.f32.mrf.mxu2  ;;  %v4806_v51 = vadd.f32 %v988_v53, %v872_v13 }
  0xe0   : > { %5935 = vst [vmem:[#allocation23_spill] sm:$0xff] %v4806_v51  ;;  %3974 = vmatmul.msk.f32.gmra.mxu1 %vm425_vm2, %v1548_v56  ;;  %v1071_v56 = vsel %vm4817_vm1, %v4799_v45, 0.0 }
  0xe1   : > { %v4811_v2 = vpop.f32.mrf.mxu0 }
  0xe2   : > { %3940 = vmatmul.msk.f32.gmra.mxu3 %vm425_vm2, %v4534_v1 }
  0xe3   : > { %3924 = vmatmul.msk.f32.gmra.mxu2 %vm425_vm2, %v4790_v37 }
  0xe4   : > { %3958 = vmatmul.msk.f32.gmra.mxu0 %vm425_vm2, %v4532_v0 }
  0xe5   : > { %v991_v31 = vpop.f32.mrf.mxu3  ;;  %v4825_v53 = vpop.f32.mrf.mxu1 }
  0xe6   : > { %v878_v13 = vpop.f32.mrf.mxu2  ;;  %v4823_v44 = vadd.f32 %v991_v31, %v875_v48  ;;  %v470_v48 = vadd.s32 104, %v4434_v27  ;;  %v4842_v31 = vld [vmem:[#allocation2 + $0x71] sm:$0xff] }
  0xe7   : > { %5940 = vst [vmem:[#allocation26_spill] sm:$0xff] %v4842_v31  ;;  %v1550_v51 = vsel %vm4817_vm1, %v4842_v31, 0.0 }
  0xe8   : > { %5939 = vst [vmem:[#allocation25_spill] sm:$0xff] %v4823_v44  ;;  %3975 = vmatmul.msk.f32.gmra.mxu1 %vm425_vm2, %v4833_v12 }
  0xe9   : > { %v4837_v0 = vpop.f32.mrf.mxu0 }
  0xea   : > { %3941 = vmatmul.msk.f32.gmra.mxu3 %vm425_vm2, %v1235_v62 }
  0xeb   : > { %3925 = vmatmul.msk.f32.gmra.mxu2 %vm425_vm2, %v1071_v56  ;;  %v568_v56 = vand.u32 15, %v470_v48 }
  0xec   : > { %3959 = vmatmul.msk.f32.gmra.mxu0 %vm425_vm2, %v4561_v9  ;;  %v5942_v9 = vmov 0 }
  0xed   : > { %v994_v44 = vpop.f32.mrf.mxu3  ;;  %v4851_v38 = vpop.f32.mrf.mxu1  ;;  %vm4860_vm3 = vcmp.ne.s32.totalorder %v568_v56, 15  ;;  %v1237_v56 = vsel %vm4550_vm9, %v4600_v23, 0.0 }
  0xee   : > { %v881_v54 = vpop.f32.mrf.mxu2  ;;  %v4849_v57 = vadd.f32 %v994_v44, %v878_v13  ;;  %v5943_v9 = vsel %vm4860_vm3, 4294967295, %v5942_v9  ;;  %v1073_v24 = vsel %vm4860_vm3, %v4842_v31, 0.0 }
  0xef   : > { %5944 = vst [vmem:[#allocation28_spill] sm:$0xff] %v5943_v9  ;;  %v5950_v9 = vmov 0 }
  0xf0   : > { %5941 = vst [vmem:[#allocation27_spill] sm:$0xff] %v4849_v57  ;;  %3976 = vmatmul.msk.f32.gmra.mxu1 %vm425_vm2, %v1550_v51  ;;  %v4876_v57 = vld [vmem:[#allocation2 + $0x79] sm:$0xff] }
  0xf1   : > { %v4854_v62 = vpop.f32.mrf.mxu0  ;;  %5946 = vst [vmem:[#allocation30_spill] sm:$0xff] %v4876_v57 }
  0xf2   : > { %3942 = vmatmul.msk.f32.gmra.mxu3 %vm425_vm2, %v4580_v17 }
  0xf3   : > { %3926 = vmatmul.msk.f32.gmra.mxu2 %vm425_vm2, %v4833_v12 }
  0xf4   : > { %3960 = vmatmul.msk.f32.gmra.mxu0 %vm425_vm2, %v4578_v16 }
  0xf5   : > { %v997_v44 = vpop.f32.mrf.mxu3  ;;  %v4868_v51 = vpop.f32.mrf.mxu1 }
  0xf6   : > { %v884_v13 = vpop.f32.mrf.mxu2  ;;  %v4866_v48 = vadd.f32 %v997_v44, %v881_v54  ;;  %v472_v54 = vadd.s32 120, %v4434_v27  ;;  %v4885_v44 = vld [vmem:[#allocation2 + $0x81] sm:$0xff] }
  0xf7   : > { %5947 = vst [vmem:[#allocation31_spill] sm:$0xff] %v4885_v44  ;;  %v1552_v23 = vsel %vm4860_vm3, %v4885_v44, 0.0  ;;  %v4899_v27 = vld [vmem:[#allocation2 + $0x88] sm:$0xff] }
  0xf8   : > { %5945 = vst [vmem:[#allocation29_spill] sm:$0xff] %v4866_v48  ;;  %3977 = vmatmul.msk.f32.gmra.mxu1 %vm425_vm2, %v4876_v57 }
  0xf9   : > { %v4880_v16 = vpop.f32.mrf.mxu0  ;;  %5949 = vst [vmem:[#allocation33_spill] sm:$0xff] %v4899_v27 }
  0xfa   : > { %3943 = vmatmul.msk.f32.gmra.mxu3 %vm425_vm2, %v1237_v56 }
  0xfb   : > { %3927 = vmatmul.msk.f32.gmra.mxu2 %vm425_vm2, %v1073_v24  ;;  %v582_v24 = vand.u32 15, %v472_v54  ;;  %v4913_v54 = vld [vmem:[#allocation2 + $0x89] sm:$0xff] }
  0xfc   : > { %3961 = vmatmul.msk.f32.gmra.mxu0 %vm425_vm2, %v4607_v26  ;;  %5954 = vst [vmem:[#allocation36_spill] sm:$0xff] %v4913_v54 }
  0xfd   : > { %v1000_v48 = vpop.f32.mrf.mxu3  ;;  %v4894_v31 = vpop.f32.mrf.mxu1  ;;  %vm4905_vm9 = vcmp.ne.s32.totalorder %v582_v24, 15 }
  0xfe   : > { %v887_v6 = vpop.f32.mrf.mxu2  ;;  %v4892_v17 = vadd.f32 %v1000_v48, %v884_v13  ;;  %v5951_v9 = vsel %vm4905_vm9, 4294967295, %v5950_v9  ;;  %v4909_v13 = vld [vmem:[#allocation2 + $0x87] sm:$0xff]  ;;  %v1075_v24 = vsel %vm4905_vm9, %v4885_v44, 0.0  ;;  %v4944_v44 = vld [vmem:[#allocation2 + $0x8f] sm:$0xff] }
  0xff   : > { %5952 = vst [vmem:[#allocation34_spill] sm:$0xff] %v5951_v9 }
 0x100   : > { %5948 = vst [vmem:[#allocation32_spill] sm:$0xff] %v4892_v17  ;;  %3978 = vmatmul.msk.f32.gmra.mxu1 %vm425_vm2, %v1552_v23 }
 0x101   : > { %v4897_v56 = vpop.f32.mrf.mxu0  ;;  %5953 = vst [vmem:[#allocation35_spill] sm:$0xff] %v4909_v13 }
 0x102   : > { %3944 = vmatmul.msk.f32.gmra.mxu3 %vm425_vm2, %v4623_v35  ;;  %v1239_v35 = vsel %vm4596_vm11, %v4909_v13, 0.0 }
 0x103   : > { %3928 = vmatmul.msk.f32.gmra.mxu2 %vm425_vm2, %v4876_v57  ;;  %v4929_v57 = vld [vmem:[#allocation2 + $0x90] sm:$0xff] }
 0x104   : > { %3962 = vmatmul.msk.f32.gmra.mxu0 %vm425_vm2, %v4899_v27  ;;  %5956 = vst [vmem:[#allocation38_spill] sm:$0xff] %v4929_v57 }
 0x105   : > { %v1003_v48 = vpop.f32.mrf.mxu3  ;;  %v4917_v26 = vpop.f32.mrf.mxu1 }
 0x106   : > { %v890_v23 = vpop.f32.mrf.mxu2  ;;  %v4915_v17 = vadd.f32 %v1003_v48, %v887_v6  ;;  %v4933_v6 = vld [vmem:[#allocation2 + $0x91] sm:$0xff] }
 0x107   : > { %v1554_v22 = vsel %vm4905_vm9, %v4933_v6, 0.0 }
 0x108   : > { %5955 = vst [vmem:[#allocation37_spill] sm:$0xff] %v4915_v17  ;;  %3979 = vmatmul.msk.f32.gmra.mxu1 %vm425_vm2, %v4913_v54 }
 0x109   : > { %v4927_v27 = vpop.f32.mrf.mxu0 }
 0x10a   : > { %3945 = vmatmul.msk.f32.gmra.mxu3 %vm425_vm2, %v1239_v35  ;;  %v1704_v35 = vsel %vm4446_vm4, %v4548_v5, 0.0  ;;  %vm5958_vm4 = vcmask 1043456  }
 0x10b   : > { %3929 = vmatmul.msk.f32.gmra.mxu2 %vm425_vm2, %v1075_v24  ;;  %vm5959_vm9 = vmmov %vm5958_vm4 }
 0x10c   : > { %3963 = vmatmul.msk.f32.gmra.mxu0 %vm425_vm2, %v4929_v57  ;;  %v2390_v57 = vpop.permute.xlu0 %2389 }
 0x10d   : > { %v1006_v17 = vpop.f32.mrf.mxu3  ;;  %v4942_v13 = vpop.f32.mrf.mxu1  ;;  %4049 = vmatpush.msk.msrb.mxu2 %vm5958_vm4, %v2390_v57 }
 0x10e   : > { %v893_v48 = vpop.f32.mrf.mxu2  ;;  %v4940_v54 = vadd.f32 %v1006_v17, %v890_v23  ;;  %v965_v17 = vadd.f32 %v4782_v18, %v4770_v8  ;;  %v2019_v8 = vsel %vm4634_vm12, %v4694_v15, 0.0  ;;  %v1706_v15 = vsel %vm4490_vm6, %v4594_v21, 0.0 }
 0x10f   : > { %v971_v21 = vadd.f32 %v4825_v53, %v4811_v2  ;;  %v974_v53 = vadd.f32 %v4851_v38, %v4837_v0 }
 0x110   : > { %5957 = vst [vmem:[#allocation39_spill] sm:$0xff] %v4940_v54  ;;  %3980 = vmatmul.msk.f32.gmra.mxu1 %vm425_vm2, %v1554_v22 }
 0x111   : > { %v1459_v24 = vpop.f32.mrf.mxu0 }
 0x112   : > { %3946 = vmatmul.msk.f32.gmra.mxu3 %vm425_vm2, %v4944_v44 }
 0x113   : > { %3982 = vmatmul.msk.f32.vlgmr.msra.gmra.mxu2 %vm425_vm2, %v1704_v35 }
 0x114   : > { %4016 = vmatmul.msk.f32.vlgmr.msra.gmra.mxu0 %vm425_vm2, %v4684_v10 }
 0x115   : > { %v1009_v23 = vpop.f32.mrf.mxu3  ;;  %v1624_v5 = vpop.f32.mrf.mxu1 }
 0x116   : > { %v1145_v9 = vpop.f32.mrf.mxu2  ;;  %v4957_v54 = vadd.f32 %v1009_v23, %v893_v48  ;;  %v2541_v22 = vpop.permute.xlu1 %2540 }
 0x117   : > { %v1193_v34 = vadd.f32 %v1145_v9, %v965_v17  ;;  %4066 = vmatpush.msk.msrb.mxu3 %vm5959_vm9, %v2541_v22  ;;  %v968_v9 = vadd.f32 %v4808_v60, %v4794_v41  ;;  %vm5960_vm9 = vmmov %vm5958_vm4 }
 0x118   : > { %4033 = vmatmul.msk.f32.vlgmr.msra.gmra.mxu1 %vm425_vm2, %v4436_v28 }
 0x119   : > { %v1462_v35 = vpop.f32.mrf.mxu0 }
 0x11a   : > { %3999 = vmatmul.msk.f32.vlgmr.msra.gmra.mxu3 %vm425_vm2, %v4538_v3 }
 0x11b   : > { %3983 = vmatmul.msk.f32.gmra.mxu2 %vm425_vm2, %v4576_v14 }
 0x11c   : > { %4017 = vmatmul.msk.f32.gmra.mxu0 %vm425_vm2, %v2019_v8  ;;  %v3190_v8 = vld [vmem:[%s5830_s3 + $0x18] sm:$0xf] }
 0x11d   : > { %v1310_v57 = vpop.f32.mrf.mxu3  ;;  %v1627_v48 = vpop.f32.mrf.mxu1  ;;  %3192 = vrot.lane.b32.xlu0 %v3190_v8, %s4294_s26 }
 0x11e   : > { %v1148_v28 = vpop.f32.mrf.mxu2  ;;  %v1358_v18 = vadd.f32 %v1310_v57, %v1193_v34  ;;  %v2708_v14 = vpop.permute.xlu1 %2707 }
 0x11f   : > { %v1194_v10 = vadd.f32 %v1148_v28, %v968_v9  ;;  %4083 = vmatpush.msk.msrb.mxu0 %vm5958_vm4, %v2708_v14  ;;  %v2859_v34 = vpop.permute.xlu2 %2858 }
 0x120   : > { %v1507_v17 = vadd.f32 %v1459_v24, %v1358_v18  ;;  %4034 = vmatmul.msk.f32.gmra.mxu1 %vm425_vm2, %v4466_v40 }
 0x121   : > { %v1465_v23 = vpop.f32.mrf.mxu0  ;;  %4100 = vmatpush.msk.msrb.mxu1 %vm5960_vm9, %v2859_v34 }
 0x122   : > { %v4979_v41 = vadd.f32 %v1624_v5, %v1507_v17  ;;  %4000 = vmatmul.msk.f32.gmra.mxu3 %vm425_vm2, %v4567_v11 }
 0x123   : > { %3984 = vmatmul.msk.f32.gmra.mxu2 %vm425_vm2, %v1706_v15  ;;  %v977_v15 = vadd.f32 %v4868_v51, %v4854_v62 }
 0x124   : > { %4018 = vmatmul.msk.f32.gmra.mxu0 %vm425_vm2, %v4719_v39  ;;  %v2021_v39 = vsel %vm4665_vm13, %v4726_v43, 0.0  ;;  %v3341_v43 = vld [vmem:[%s5830_s3 + $0x1c] sm:$0xf] }
 0x125   : > { %v1313_v60 = vpop.f32.mrf.mxu3  ;;  %v1630_v5 = vpop.f32.mrf.mxu1  ;;  %3343 = vrot.lane.b32.xlu1 %v3341_v43, %s4294_s26 }
 0x126   : > { %v1151_v40 = vpop.f32.mrf.mxu2  ;;  %v1359_v22 = vadd.f32 %v1313_v60, %v1194_v10 }
 0x127   : > { %v1195_v24 = vadd.f32 %v1151_v40, %v971_v21  ;;  %v2023_v40 = vsel %vm4707_vm14, %v4762_v63, 0.0 }
 0x128   : > { %v1508_v9 = vadd.f32 %v1462_v35, %v1359_v22  ;;  %4035 = vmatmul.msk.f32.gmra.mxu1 %vm425_vm2, %v4484_v49 }
 0x129   : > { %v1468_v28 = vpop.f32.mrf.mxu0 }
 0x12a   : > { %v4998_v2 = vadd.f32 %v1627_v48, %v1508_v9  ;;  %4001 = vmatmul.msk.f32.gmra.mxu3 %vm425_vm2, %v4584_v19 }
 0x12b   : > { %3985 = vmatmul.msk.f32.gmra.mxu2 %vm425_vm2, %v4621_v32  ;;  %v1708_v32 = vsel %vm4544_vm8, %v4444_v33, 0.0 }
 0x12c   : > { %4019 = vmatmul.msk.f32.gmra.mxu0 %vm425_vm2, %v2021_v39 }
 0x12d   : > { %v1316_v49 = vpop.f32.mrf.mxu3  ;;  %v1633_v18 = vpop.f32.mrf.mxu1 }
 0x12e   : > { %v1154_v35 = vpop.f32.mrf.mxu2  ;;  %v1360_v10 = vadd.f32 %v1316_v49, %v1195_v24 }
 0x12f   : > { %v1196_v57 = vadd.f32 %v1154_v35, %v974_v53  ;;  %v3508_v53 = vld [vmem:[%s5830_s3 + $0x20] sm:$0xf] }
 0x130   : > { %v1509_v48 = vadd.f32 %v1465_v23, %v1360_v10  ;;  %4036 = vmatmul.msk.f32.gmra.mxu1 %vm425_vm2, %v4521_v59  ;;  %v5373_v10 = vld [vmem:[#allocation2 + $0x49] sm:$0xff] }
 0x131   : > { %v1471_v38 = vpop.f32.mrf.mxu0 }
 0x132   : > { %v5016_v0 = vadd.f32 %v1630_v5, %v1509_v48  ;;  %4002 = vmatmul.msk.f32.gmra.mxu3 %vm425_vm2, %v4613_v30  ;;  %v5087_v48 = vld [vmem:[#allocation2 + $0x48] sm:$0xff] }
 0x133   : > { %3986 = vmatmul.msk.f32.gmra.mxu2 %vm425_vm2, %v1708_v32 }
 0x134   : > { %4020 = vmatmul.msk.f32.gmra.mxu0 %vm425_vm2, %v4754_v58  ;;  %v3023_v58 = vld [vmem:[%s5830_s3 + $0x14] sm:$0xf] }
 0x135   : > { %v1319_v17 = vpop.f32.mrf.mxu3  ;;  %v1636_v34 = vpop.f32.mrf.mxu1  ;;  %3025 = vrot.lane.b32.xlu2 %v3023_v58, %s4294_s26 }
 0x136   : > { %v1157_v33 = vpop.f32.mrf.mxu2  ;;  %v1361_v23 = vadd.f32 %v1319_v17, %v1196_v57 }
 0x137   : > { %v1197_v14 = vadd.f32 %v1157_v33, %v977_v15 }
 0x138   : > { %v1510_v59 = vadd.f32 %v1468_v28, %v1361_v23  ;;  %4037 = vmatmul.msk.f32.gmra.mxu1 %vm425_vm2, %v4538_v3  ;;  %v980_v3 = vadd.f32 %v4894_v31, %v4880_v16  ;;  %v983_v16 = vadd.f32 %v4917_v26, %v4897_v56  ;;  %v2025_v26 = vsel %vm4739_vm15, %v4799_v45, 0.0 }
 0x139   : > { %v1474_v21 = vpop.f32.mrf.mxu0 }
 0x13a   : > { %v5030_v60 = vadd.f32 %v1633_v18, %v1510_v59  ;;  %4003 = vmatmul.msk.f32.gmra.mxu3 %vm425_vm2, %v4426_v25  ;;  %v1710_v25 = vsel %vm4590_vm10, %v4508_v55, 0.0  ;;  %v1712_v18 = vsel %vm4458_vm5, %v4554_v7, 0.0  ;;  %v5963_v7 = vld [vmem:[#allocation23_spill] sm:$0xff] }
 0x13b   : > { %3987 = vmatmul.msk.f32.gmra.mxu2 %vm425_vm2, %v4481_v47 }
 0x13c   : > { %4021 = vmatmul.msk.f32.gmra.mxu0 %vm425_vm2, %v2023_v40 }
 0x13d   : > { %v1322_v62 = vpop.f32.mrf.mxu3  ;;  %v1639_v22 = vpop.f32.mrf.mxu1  ;;  %3510 = vrot.lane.b32.xlu2 %v3508_v53, %s4294_s26  ;;  %v5973_v53 = vld [vmem:[#allocation27_spill] sm:$0xff] }
 0x13e   : > { %v1160_v63 = vpop.f32.mrf.mxu2  ;;  %v1362_v24 = vadd.f32 %v1322_v62, %v1197_v14  ;;  %v5964_v14 = vld [vmem:[#allocation26_spill] sm:$0xff] }
 0x13f   : > { %v1198_v51 = vadd.f32 %v1160_v63, %v980_v3  ;;  %v5102_v3 = vld [vmem:[#allocation2 + $0x50] sm:$0xff]  ;;  %v5968_v63 = vld [vmem:[#allocation25_spill] sm:$0xff] }
 0x140   : > { %v1511_v47 = vadd.f32 %v1471_v38, %v1362_v24  ;;  %4038 = vmatmul.msk.f32.gmra.mxu1 %vm425_vm2, %v4567_v11 }
 0x141   : > { %v1477_v5 = vpop.f32.mrf.mxu0 }
 0x142   : > { %v5048_v8 = vadd.f32 %v1636_v34, %v1511_v47  ;;  %4004 = vmatmul.msk.f32.gmra.mxu3 %vm425_vm2, %v4453_v36  ;;  %v2027_v34 = vsel %vm4776_vm0, %v5964_v14, 0.0 }
 0x143   : > { %3988 = vmatmul.msk.f32.gmra.mxu2 %vm425_vm2, %v1710_v25  ;;  %v5415_v25 = vld [vmem:[#allocation2 + $0x59] sm:$0xff] }
 0x144   : > { %4022 = vmatmul.msk.f32.gmra.mxu0 %vm425_vm2, %v4790_v37 }
 0x145   : > { %v1325_v55 = vpop.f32.mrf.mxu3  ;;  %v1642_v39 = vpop.f32.mrf.mxu1 }
 0x146   : > { %v1163_v31 = vpop.f32.mrf.mxu2  ;;  %v1363_v28 = vadd.f32 %v1325_v55, %v1198_v51  ;;  %v5971_v55 = vld [vmem:[#allocation13_spill] sm:$0xff] }
 0x147   : > { %v1199_v9 = vadd.f32 %v1163_v31, %v983_v16 }
 0x148   : > { %v1512_v11 = vadd.f32 %v1474_v21, %v1363_v28  ;;  %4039 = vmatmul.msk.f32.gmra.mxu1 %vm425_vm2, %v4584_v19  ;;  %v986_v19 = vadd.f32 %v4942_v13, %v4927_v27  ;;  %v5962_v27 = vld [vmem:[#allocation9_spill] sm:$0xff]  ;;  %v5967_v21 = vld [vmem:[#allocation10_spill] sm:$0xff] }
 0x149   : > { %v1480_v36 = vpop.f32.mrf.mxu0 }
 0x14a   : > { %v5066_v37 = vadd.f32 %v1639_v22, %v1512_v11  ;;  %4005 = vmatmul.msk.f32.gmra.mxu3 %vm425_vm2, %v4479_v46  ;;  %v5969_v22 = vld [vmem:[#allocation18_spill] sm:$0xff]  ;;  %v5117_v11 = vld [vmem:[#allocation2 + $0x58] sm:$0xff] }
 0x14b   : > { %3989 = vmatmul.msk.f32.gmra.mxu2 %vm425_vm2, %v4534_v1  ;;  %v1714_v47 = vsel %vm4504_vm7, %v5969_v22, 0.0 }
 0x14c   : > { %4023 = vmatmul.msk.f32.gmra.mxu0 %vm425_vm2, %v2025_v26 }
 0x14d   : > { %v1328_v35 = vpop.f32.mrf.mxu3  ;;  %v1645_v45 = vpop.f32.mrf.mxu1 }
 0x14e   : > { %v1166_v56 = vpop.f32.mrf.mxu2  ;;  %v1364_v57 = vadd.f32 %v1328_v35, %v1199_v9  ;;  %v5972_v9 = vld [vmem:[#allocation30_spill] sm:$0xff] }
 0x14f   : > { %v1200_v49 = vadd.f32 %v1166_v56, %v986_v19 }
 0x150   : > { %v1513_v43 = vadd.f32 %v1477_v5, %v1364_v57  ;;  %4040 = vmatmul.msk.f32.gmra.mxu1 %vm425_vm2, %v4613_v30 }
 0x151   : > { %v1483_v1 = vpop.f32.mrf.mxu0 }
 0x152   : > { %v5080_v46 = vadd.f32 %v1642_v39, %v1513_v43  ;;  %4006 = vmatmul.msk.f32.gmra.mxu3 %vm425_vm2, %v5962_v27  ;;  %v5976_v43 = vld [vmem:[#allocation20_spill] sm:$0xff] }
 0x153   : > { %3990 = vmatmul.msk.f32.gmra.mxu2 %vm425_vm2, %v1712_v18 }
 0x154   : > { %4024 = vmatmul.msk.f32.gmra.mxu0 %vm425_vm2, %v4833_v12  ;;  %v5966_v12 = vld [vmem:[#allocation15_spill] sm:$0xff] }
 0x155   : > { %v1331_v32 = vpop.f32.mrf.mxu3  ;;  %v1648_v33 = vpop.f32.mrf.mxu1 }
 0x156   : > { %v1169_v13 = vpop.f32.mrf.mxu2  ;;  %v1365_v15 = vadd.f32 %v1331_v32, %v1200_v49  ;;  %v5974_v49 = vld [vmem:[#allocation31_spill] sm:$0xff]  ;;  %v5132_v32 = vld [vmem:[#allocation2 + $0x60] sm:$0xff] }
 0x157   : > { %v1201_v38 = vadd.f32 %v1169_v13, %v5963_v7  ;;  %v5978_v7 = vld [vmem:[#allocation29_spill] sm:$0xff] }
 0x158   : > { %v1514_v30 = vadd.f32 %v1480_v36, %v1365_v15  ;;  %4041 = vmatmul.msk.f32.gmra.mxu1 %vm425_vm2, %v5087_v48 }
 0x159   : > { %v1486_v17 = vpop.f32.mrf.mxu0 }
 0x15a   : > { %v5095_v59 = vadd.f32 %v1645_v45, %v1514_v30  ;;  %4007 = vmatmul.msk.f32.gmra.mxu3 %vm425_vm2, %v5967_v21  ;;  %v2029_v45 = vsel %vm4817_vm1, %v5974_v49, 0.0  ;;  %v5979_v30 = vld [vmem:[#allocation35_spill] sm:$0xff] }
 0x15b   : > { %3991 = vmatmul.msk.f32.gmra.mxu2 %vm425_vm2, %v5966_v12 }
 0x15c   : > { %4025 = vmatmul.msk.f32.gmra.mxu0 %vm425_vm2, %v2027_v34 }
 0x15d   : > { %v1334_v58 = vpop.f32.mrf.mxu3  ;;  %v1651_v24 = vpop.f32.mrf.mxu1 }
 0x15e   : > { %v1172_v40 = vpop.f32.mrf.mxu2  ;;  %v1366_v51 = vadd.f32 %v1334_v58, %v1201_v38  ;;  %v5983_v58 = vld [vmem:[#allocation36_spill] sm:$0xff] }
 0x15f   : > { %v1202_v62 = vadd.f32 %v1172_v40, %v5968_v63  ;;  %v5982_v40 = vld [vmem:[#allocation19_spill] sm:$0xff] }
 0x160   : > { %v1515_v5 = vadd.f32 %v1483_v1, %v1366_v51  ;;  %4042 = vmatmul.msk.f32.gmra.mxu1 %vm425_vm2, %v5102_v3  ;;  %v5977_v1 = vld [vmem:[#allocation14_spill] sm:$0xff]  ;;  %v5147_v51 = vld [vmem:[#allocation2 + $0x68] sm:$0xff] }
 0x161   : > { %v1489_v16 = vpop.f32.mrf.mxu0 }
 0x162   : > { %v5110_v31 = vadd.f32 %v1648_v33, %v1515_v5  ;;  %4008 = vmatmul.msk.f32.gmra.mxu3 %vm425_vm2, %v5971_v55 }
 0x163   : > { %3992 = vmatmul.msk.f32.gmra.mxu2 %vm425_vm2, %v1714_v47 }
 0x164   : > { %4026 = vmatmul.msk.f32.gmra.mxu0 %vm425_vm2, %v5972_v9  ;;  %v5985_v9 = vld [vmem:[#allocation28_spill] sm:$0xff] }
 0x165   : > { %v1337_v39 = vpop.f32.mrf.mxu3  ;;  %v1654_v19 = vpop.f32.mrf.mxu1 }
 0x166   : > { %v1175_v28 = vpop.f32.mrf.mxu2  ;;  %v1367_v26 = vadd.f32 %v1337_v39, %v1202_v62 }
 0x167   : > { %v1203_v36 = vadd.f32 %v1175_v28, %v5973_v53  ;;  %v2031_v28 = vsel %vm4860_vm3, %v4933_v6, 0.0  ;;  %v5986_v53 = vld [vmem:[#allocation33_spill] sm:$0xff]  ;;  %vm5995_vm3 = vcmask 1043456  }
 0x168   : > { %v1516_v56 = vadd.f32 %v1486_v17, %v1367_v26  ;;  %4043 = vmatmul.msk.f32.gmra.mxu1 %vm425_vm2, %v5117_v11  ;;  %v5980_v17 = vld [vmem:[#allocation12_spill] sm:$0xff] }
 0x169   : > { %v1492_v35 = vpop.f32.mrf.mxu0  ;;  %vm5981_vm4 = vnez %v5980_v17  ;;  %v5457_v17 = vld [vmem:[#allocation2 + $0x69] sm:$0xff] }
 0x16a   : > { %v5125_v18 = vadd.f32 %v1651_v24, %v1516_v56  ;;  %4009 = vmatmul.msk.f32.gmra.mxu3 %vm425_vm2, %v5977_v1  ;;  %v1716_v14 = vsel %vm5981_vm4, %v5979_v30, 0.0  ;;  %v5984_v24 = vld [vmem:[#allocation32_spill] sm:$0xff]  ;;  %v5162_v56 = vld [vmem:[#allocation2 + $0x70] sm:$0xff]  ;;  %v5175_v30 = vld [vmem:[#allocation2 + $0x78] sm:$0xff] }
 0x16b   : > { %3993 = vmatmul.msk.f32.gmra.mxu2 %vm425_vm2, %v5976_v43 }
 0x16c   : > { %4027 = vmatmul.msk.f32.gmra.mxu0 %vm425_vm2, %v2029_v45 }
 0x16d   : > { %v1340_v13 = vpop.f32.mrf.mxu3  ;;  %v1657_v33 = vpop.f32.mrf.mxu1 }
 0x16e   : > { %v1178_v27 = vpop.f32.mrf.mxu2  ;;  %v1368_v15 = vadd.f32 %v1340_v13, %v1203_v36  ;;  %v1702_v36 = vld [vmem:[#allocation2 + $0x97] sm:$0xff] }
 0x16f   : > { %v1204_v38 = vadd.f32 %v1178_v27, %v5978_v7  ;;  %v1718_v1 = vsel %vm4596_vm11, %v1702_v36, 0.0  ;;  %v2016_v13 = vld [vmem:[#allocation2 + $0x99] sm:$0xff] }
 0x170   : > { %v1517_v34 = vadd.f32 %v1489_v16, %v1368_v15  ;;  %4044 = vmatmul.msk.f32.gmra.mxu1 %vm425_vm2, %v5132_v32 }
 0x171   : > { %v1495_v12 = vpop.f32.mrf.mxu0 }
 0x172   : > { %v5140_v21 = vadd.f32 %v1654_v19, %v1517_v34  ;;  %4010 = vmatmul.msk.f32.gmra.mxu3 %vm425_vm2, %v5982_v40 }
 0x173   : > { %3994 = vmatmul.msk.f32.gmra.mxu2 %vm425_vm2, %v1716_v14  ;;  %v5990_v14 = vld [vmem:[#allocation39_spill] sm:$0xff] }
 0x174   : > { %4028 = vmatmul.msk.f32.gmra.mxu0 %vm425_vm2, %v5983_v58  ;;  %v2017_v58 = vld [vmem:[#allocation2 + $0xa1] sm:$0xff] }
 0x175   : > { %v1343_v62 = vpop.f32.mrf.mxu3  ;;  %v1660_v5 = vpop.f32.mrf.mxu1 }
 0x176   : > { %v1181_v63 = vpop.f32.mrf.mxu2  ;;  %v1369_v47 = vadd.f32 %v1343_v62, %v1204_v38  ;;  %v5989_v38 = vld [vmem:[#allocation38_spill] sm:$0xff]  ;;  %v1867_v62 = vld [vmem:[#allocation2 + $0x98] sm:$0xff] }
 0x177   : > { %v1205_v22 = vadd.f32 %v1181_v63, %v5984_v24  ;;  %v1703_v63 = vld [vmem:[#allocation2 + $0x9f] sm:$0xff] }
 0x178   : > { %v1518_v16 = vadd.f32 %v1492_v35, %v1369_v47  ;;  %4045 = vmatmul.msk.f32.gmra.mxu1 %vm425_vm2, %v5147_v51  ;;  %v5987_v35 = vld [vmem:[#allocation37_spill] sm:$0xff]  ;;  %v5991_v47 = vld [vmem:[#allocation34_spill] sm:$0xff] }
 0x179   : > { %v1498_v55 = vpop.f32.mrf.mxu0  ;;  %vm5992_vm9 = vnez %v5991_v47 }
 0x17a   : > { %v5155_v39 = vadd.f32 %v1657_v33, %v1518_v16  ;;  %4011 = vmatmul.msk.f32.gmra.mxu3 %vm425_vm2, %v5986_v53 }
 0x17b   : > { %3995 = vmatmul.msk.f32.gmra.mxu2 %vm425_vm2, %v4944_v44 }
 0x17c   : > { %4029 = vmatmul.msk.f32.gmra.mxu0 %vm425_vm2, %v2031_v28  ;;  %v2220_v28 = vld [vmem:[#allocation2 + $0x7] sm:$0xff] }
 0x17d   : > { %v1346_v19 = vpop.f32.mrf.mxu3  ;;  %v1663_v43 = vpop.f32.mrf.mxu1 }
 0x17e   : > { %v1184_v26 = vpop.f32.mrf.mxu2  ;;  %v1370_v45 = vadd.f32 %v1346_v19, %v1205_v22 }
 0x17f   : > { %v1206_v49 = vadd.f32 %v1184_v26, %v5987_v35  ;;  %v5187_v26 = vld [vmem:[#allocation2 + $0x80] sm:$0xff] }
 0x180   : > { %v1519_v27 = vadd.f32 %v1495_v12, %v1370_v45  ;;  %4046 = vmatmul.msk.f32.gmra.mxu1 %vm425_vm2, %v5162_v56  ;;  %v1868_v45 = vld [vmem:[#allocation2 + $0xa0] sm:$0xff] }
 0x181   : > { %v1501_v44 = vpop.f32.mrf.mxu0 }
 0x182   : > { %v5169_v7 = vadd.f32 %v1660_v5, %v1519_v27  ;;  %4012 = vmatmul.msk.f32.gmra.mxu3 %vm425_vm2, %v5989_v38  ;;  %v2033_v5 = vsel %vm5992_vm9, %v2017_v58, 0.0  ;;  %v2221_v58 = vld [vmem:[#allocation2 + $0xf] sm:$0xff] }
 0x183   : > { %3996 = vmatmul.msk.f32.gmra.mxu2 %vm425_vm2, %v1718_v1  ;;  %v5993_v1 = vld [vmem:[#allocation6_spill] sm:$0xff] }
 0x184   : > { %4030 = vmatmul.msk.f32.gmra.mxu0 %vm425_vm2, %v2016_v13  ;;  %vm5994_vm9 = vnez %v5993_v1 }
 0x185   : > { %v1349_v33 = vpop.f32.mrf.mxu3  ;;  %v1666_v40 = vpop.f32.mrf.mxu1 }
 0x186   : > { %v1187_v15 = vpop.f32.mrf.mxu2  ;;  %v1371_v12 = vadd.f32 %v1349_v33, %v1206_v49  ;;  %v2222_v49 = vld [vmem:[#allocation2 + $0x17] sm:$0xff] }
 0x187   : > { %v1207_v34 = vadd.f32 %v1187_v15, %v5990_v14  ;;  %v2689_v38 = vsel %vm5994_vm9, %v2222_v49, 0.0  ;;  %v2840_v14 = vld [vmem:[#allocation2 + $0x18] sm:$0xff] }
 0x188   : > { %v1520_v24 = vadd.f32 %v1498_v55, %v1371_v12  ;;  %4047 = vmatmul.msk.f32.gmra.mxu1 %vm425_vm2, %v5175_v30 }
 0x189   : > { %v1504_v22 = vpop.f32.mrf.mxu0 }
 0x18a   : > { %v5182_v16 = vadd.f32 %v1663_v43, %v1520_v24  ;;  %4013 = vmatmul.msk.f32.gmra.mxu3 %vm425_vm2, %v1867_v62  ;;  %v2236_v43 = vsel %vm5994_vm9, %v2220_v28, 0.0  ;;  %v2223_v24 = vld [vmem:[#allocation2 + $0x1f] sm:$0xff]  ;;  %vm2203_vm9 = vcmask 64512  }
 0x18b   : > { %3997 = vmatmul.msk.f32.gmra.mxu2 %vm425_vm2, %v1703_v63  ;;  %v2506_v63 = vld [vmem:[#allocation2 + $0x9] sm:$0xff] }
 0x18c   : > { %4031 = vmatmul.msk.f32.gmra.mxu0 %vm425_vm2, %v2033_v5 }
 0x18d   : > { %v1352_v36 = vpop.f32.mrf.mxu3  ;;  %v1669_v35 = vpop.f32.mrf.mxu1 }
 0x18e   : > { %v1190_v53 = vpop.f32.mrf.mxu2  ;;  %v1372_v19 = vadd.f32 %v1352_v36, %v1207_v34 }
 0x18f   : > { %v1208_v55 = vadd.f32 %v1190_v53, %v4957_v54  ;;  %v3026_v12 = vpop.permute.xlu2 %3025  ;;  %v2507_v53 = vld [vmem:[#allocation2 + $0x11] sm:$0xff] }
 0x190   : > { %v1521_v27 = vadd.f32 %v1501_v44, %v1372_v19  ;;  %4048 = vmatmul.msk.f32.gmra.mxu1 %vm425_vm2, %v5187_v26  ;;  %4117 = vmatpush.msk.msra.mxu2 %vm5995_vm3, %v3026_v12  ;;  %v2841_v19 = vld [vmem:[#allocation2 + $0x20] sm:$0xff] }
 0x191   : > { %v2103_v13 = vpop.f32.mrf.mxu0 }
 0x192   : > { %v5196_v15 = vadd.f32 %v1666_v40, %v1521_v27  ;;  %4014 = vmatmul.msk.f32.gmra.mxu3 %vm425_vm2, %v1868_v45  ;;  %v3193_v27 = vpop.permute.xlu0 %3192 }
 0x193   : > { %4050 = vmatmul.msk.f32.vlgmr.msrb.gmra.mxu2 %vm425_vm2, %v2236_v43  ;;  %v5218_v43 = vld [vmem:[#allocation2 + $0x27] sm:$0xff]  ;;  %4134 = vmatpush.msk.msra.mxu3 %vm5995_vm3, %v3193_v27 }
 0x194   : > { %4084 = vmatmul.msk.f32.vlgmr.msrb.gmra.mxu0 %vm425_vm2, %v2689_v38  ;;  %v2523_v38 = vsel %vm4634_vm12, %v2507_v53, 0.0 }
 0x195   : > { %v1355_v54 = vpop.f32.mrf.mxu3  ;;  %v5201_v44 = vpop.f32.mrf.mxu1 }
 0x196   : > { %v1789_v33 = vpop.f32.mrf.mxu2  ;;  %v1373_v34 = vadd.f32 %v1355_v54, %v1208_v55 }
 0x197   : > { %v1837_v28 = vadd.f32 %v1789_v33, %v4979_v41  ;;  %v2238_v41 = vsel %vm4490_vm6, %v2222_v49, 0.0  ;;  %v3344_v53 = vpop.permute.xlu1 %3343 }
 0x198   : > { %v1522_v62 = vadd.f32 %v1504_v22, %v1373_v34  ;;  %4101 = vmatmul.msk.f32.vlgmr.msrb.gmra.mxu1 %vm425_vm2, %v2840_v14  ;;  %v5214_v22 = vld [vmem:[%s5831_s4] ss:$0 sm:$0xff]  ;;  %v2691_v14 = vsel %vm4490_vm6, %v5218_v43, 0.0  ;;  %4151 = vmatpush.msk.msra.mxu0 %vm5995_vm3, %v3344_v53  ;;  %vm5996_vm6 = vmmov %vm5995_vm3  ;;  %vm6007_vm3 = vnez %v5991_v47 }
 0x199   : > { %v2106_v40 = vpop.f32.mrf.mxu0 }
 0x19a   : > { %v5205_v5 = vadd.f32 %v1669_v35, %v1522_v62  ;;  %4067 = vmatmul.msk.f32.vlgmr.msrb.gmra.mxu3 %vm425_vm2, %v2506_v63  ;;  %v5234_v63 = vld [vmem:[#allocation2 + $0x28] sm:$0xff] }
 0x19b   : > { %4051 = vmatmul.msk.f32.gmra.mxu2 %vm425_vm2, %v2221_v58 }
 0x19c   : > { %4085 = vmatmul.msk.f32.gmra.mxu0 %vm425_vm2, %v2223_v24 }
 0x19d   : > { %v1938_v55 = vpop.f32.mrf.mxu3  ;;  %v5216_v35 = vpop.f32.mrf.mxu1 }
 0x19e   : > { %v1792_v36 = vpop.f32.mrf.mxu2  ;;  %v1986_v45 = vadd.f32 %v1938_v55, %v1837_v28  ;;  %v5240_v55 = vld [vmem:[#allocation2 + $0x19] sm:$0xff] }
 0x19f   : > { %v1838_v49 = vadd.f32 %v1792_v36, %v4998_v2 }
 0x1a0   : > { %v2151_v54 = vadd.f32 %v2103_v13, %v1986_v45  ;;  %4102 = vmatmul.msk.f32.gmra.mxu1 %vm425_vm2, %v2841_v19  ;;  %v3511_v19 = vpop.permute.xlu2 %3510  ;;  %v5245_v45 = vld [vmem:[#allocation2 + $0x2f] sm:$0xff] }
 0x1a1   : > { %v2109_v33 = vpop.f32.mrf.mxu0  ;;  %4168 = vmatpush.msk.msra.mxu1 %vm5996_vm6, %v3511_v19  ;;  %vm6004_vm6 = vnez %v5985_v9 }
 0x1a2   : > { %v2171_v34 = vadd.f32 %v5214_v22, %v2151_v54  ;;  %4068 = vmatmul.msk.f32.gmra.mxu3 %vm425_vm2, %v2523_v38  ;;  %v5253_v54 = vld [vmem:[#allocation2 + $0x21] sm:$0xff] }
 0x1a3   : > { %4052 = vmatmul.msk.f32.gmra.mxu2 %vm425_vm2, %v2238_v41 }
 0x1a4   : > { %v2187_v12 = vmax.f32 %v2171_v34, 0.0  ;;  %4086 = vmatmul.msk.f32.gmra.mxu0 %vm425_vm2, %v2691_v14  ;;  %v5257_v34 = vld [vmem:[#allocation2 + $0x30] sm:$0xff] }
 0x1a5   : > { %v1941_v58 = vpop.f32.mrf.mxu3  ;;  %v5238_v28 = vpop.f32.mrf.mxu1 }
 0x1a6   : > { %v1795_v13 = vpop.f32.mrf.mxu2  ;;  %2204 = vst.msk [vmem:[%s4374_s19] sm:$0xff] %vm2203_vm9, %v2187_v12  ;;  %v1987_v62 = vadd.f32 %v1941_v58, %v1838_v49 }
 0x1a7   : > { %v1839_v41 = vadd.f32 %v1795_v13, %v5016_v0  ;;  %v2240_v0 = vsel %vm4544_vm8, %v5218_v43, 0.0  ;;  %v2525_v13 = vsel %vm4665_vm13, %v5253_v54, 0.0 }
 0x1a8   : > { %v2152_v2 = vadd.f32 %v2106_v40, %v1987_v62  ;;  %4103 = vmatmul.msk.f32.gmra.mxu1 %vm425_vm2, %v5234_v63 }
 0x1a9   : > { %v2112_v36 = vpop.f32.mrf.mxu0 }
 0x1aa   : > { %v2172_v27 = vadd.f32 %v5214_v22, %v2152_v2  ;;  %4069 = vmatmul.msk.f32.gmra.mxu3 %vm425_vm2, %v5240_v55 }
 0x1ab   : > { %4053 = vmatmul.msk.f32.gmra.mxu2 %vm425_vm2, %v2223_v24  ;;  %v5263_v24 = vld [vmem:[#allocation2 + $0x37] sm:$0xff] }
 0x1ac   : > { %v2188_v38 = vmax.f32 %v2172_v27, 0.0  ;;  %4087 = vmatmul.msk.f32.gmra.mxu0 %vm425_vm2, %v5245_v45  ;;  %v2693_v53 = vsel %vm4544_vm8, %v5263_v24, 0.0 }
 0x1ad   : > { %v1944_v14 = vpop.f32.mrf.mxu3  ;;  %v5261_v12 = vpop.f32.mrf.mxu1 }
 0x1ae   : > { %v1798_v40 = vpop.f32.mrf.mxu2  ;;  %2205 = vst.msk [vmem:[%s4374_s19 + $0x8] sm:$0xff] %vm2203_vm9, %v2188_v38  ;;  %v1988_v49 = vadd.f32 %v1944_v14, %v1839_v41  ;;  %v5281_v38 = vld [vmem:[#allocation2 + $0x38] sm:$0xff] }
 0x1af   : > { %5997 = vst [vmem:[#allocation9_spill] sm:$0xff] %v5261_v12  ;;  %v1840_v2 = vadd.f32 %v1798_v40, %v5030_v60  ;;  %v5291_v40 = vld [vmem:[#allocation2 + $0x3f] sm:$0xff] }
 0x1b0   : > { %v2153_v58 = vadd.f32 %v2109_v33, %v1988_v49  ;;  %4104 = vmatmul.msk.f32.gmra.mxu1 %vm425_vm2, %v5257_v34 }
 0x1b1   : > { %v2115_v62 = vpop.f32.mrf.mxu0 }
 0x1b2   : > { %v2173_v19 = vadd.f32 %v5214_v22, %v2153_v58  ;;  %4070 = vmatmul.msk.f32.gmra.mxu3 %vm425_vm2, %v2525_v13  ;;  %v5287_v58 = vld [vmem:[#allocation2 + $0x29] sm:$0xff] }
 0x1b3   : > { %4054 = vmatmul.msk.f32.gmra.mxu2 %vm425_vm2, %v2240_v0 }
 0x1b4   : > { %v2189_v27 = vmax.f32 %v2173_v19, 0.0  ;;  %4088 = vmatmul.msk.f32.gmra.mxu0 %vm425_vm2, %v2693_v53 }
 0x1b5   : > { %v1947_v41 = vpop.f32.mrf.mxu3  ;;  %v5285_v49 = vpop.f32.mrf.mxu1 }
 0x1b6   : > { %v1801_v33 = vpop.f32.mrf.mxu2  ;;  %2206 = vst.msk [vmem:[%s4374_s19 + $0x20] sm:$0xff] %vm2203_vm9, %v2189_v27  ;;  %v1989_v14 = vadd.f32 %v1947_v41, %v1840_v2  ;;  %v5299_v2 = vld [vmem:[#allocation2 + $0x31] sm:$0xff]  ;;  %v5303_v41 = vld [vmem:[#allocation2 + $0x40] sm:$0xff] }
 0x1b7   : > { %5998 = vst [vmem:[#allocation23_spill] sm:$0xff] %v5285_v49  ;;  %v1841_v53 = vadd.f32 %v1801_v33, %v5048_v8  ;;  %v5309_v49 = vld [vmem:[#allocation2 + $0x47] sm:$0xff]  ;;  %v2242_v8 = vsel %vm4590_vm10, %v5263_v24, 0.0  ;;  %v2527_v33 = vsel %vm4707_vm14, %v5299_v2, 0.0 }
 0x1b8   : > { %v2154_v0 = vadd.f32 %v2112_v36, %v1989_v14  ;;  %4105 = vmatmul.msk.f32.gmra.mxu1 %vm425_vm2, %v5281_v38 }
 0x1b9   : > { %v2118_v60 = vpop.f32.mrf.mxu0 }
 0x1ba   : > { %v2174_v13 = vadd.f32 %v5214_v22, %v2154_v0  ;;  %4071 = vmatmul.msk.f32.gmra.mxu3 %vm425_vm2, %v5287_v58 }
 0x1bb   : > { %4055 = vmatmul.msk.f32.gmra.mxu2 %vm425_vm2, %v5245_v45 }
 0x1bc   : > { %v2190_v19 = vmax.f32 %v2174_v13, 0.0  ;;  %4089 = vmatmul.msk.f32.gmra.mxu0 %vm425_vm2, %v5291_v40 }
 0x1bd   : > { %v1950_v27 = vpop.f32.mrf.mxu3  ;;  %v5307_v0 = vpop.f32.mrf.mxu1 }
 0x1be   : > { %v1804_v36 = vpop.f32.mrf.mxu2  ;;  %2207 = vst.msk [vmem:[%s4374_s19 + $0x28] sm:$0xff] %vm2203_vm9, %v2190_v19  ;;  %v1990_v14 = vadd.f32 %v1950_v27, %v1841_v53  ;;  %v2695_v53 = vsel %vm4590_vm10, %v5309_v49, 0.0 }
 0x1bf   : > { %5999 = vst [vmem:[#allocation26_spill] sm:$0xff] %v5307_v0  ;;  %v1842_v27 = vadd.f32 %v1804_v36, %v5066_v37 }
 0x1c0   : > { %v2155_v13 = vadd.f32 %v2115_v62, %v1990_v14  ;;  %4106 = vmatmul.msk.f32.gmra.mxu1 %vm425_vm2, %v5303_v41 }
 0x1c1   : > { %v2121_v4 = vpop.f32.mrf.mxu0 }
 0x1c2   : > { %v2175_v19 = vadd.f32 %v5214_v22, %v2155_v13  ;;  %4072 = vmatmul.msk.f32.gmra.mxu3 %vm425_vm2, %v2527_v33  ;;  %v5335_v33 = vld [vmem:[#allocation2 + $0x4f] sm:$0xff] }
 0x1c3   : > { %4056 = vmatmul.msk.f32.gmra.mxu2 %vm425_vm2, %v2242_v8 }
 0x1c4   : > { %v2191_v0 = vmax.f32 %v2175_v19, 0.0  ;;  %4090 = vmatmul.msk.f32.gmra.mxu0 %vm425_vm2, %v2695_v53  ;;  %v5343_v53 = vld [vmem:[#allocation2 + $0x41] sm:$0xff] }
 0x1c5   : > { %v1953_v14 = vpop.f32.mrf.mxu3  ;;  %v5329_v12 = vpop.f32.mrf.mxu1 }
 0x1c6   : > { %v1807_v62 = vpop.f32.mrf.mxu2  ;;  %2208 = vst.msk [vmem:[%s4374_s19 + $0x40] sm:$0xff] %vm2203_vm9, %v2191_v0  ;;  %v1991_v29 = vadd.f32 %v1953_v14, %v1842_v27  ;;  %v5351_v27 = vld [vmem:[#allocation2 + $0x57] sm:$0xff] }
 0x1c7   : > { %v1843_v36 = vadd.f32 %v1807_v62, %v5080_v46  ;;  %v2244_v46 = vsel %vm4458_vm5, %v5309_v49, 0.0  ;;  %v2529_v62 = vsel %vm4739_vm15, %v5343_v53, 0.0 }
 0x1c8   : > { %v2156_v13 = vadd.f32 %v2118_v60, %v1991_v29  ;;  %4107 = vmatmul.msk.f32.gmra.mxu1 %vm425_vm2, %v5087_v48 }
 0x1c9   : > { %v2124_v8 = vpop.f32.mrf.mxu0 }
 0x1ca   : > { %v2176_v37 = vadd.f32 %v5214_v22, %v2156_v13  ;;  %4073 = vmatmul.msk.f32.gmra.mxu3 %vm425_vm2, %v5331_v20 }
 0x1cb   : > { %4057 = vmatmul.msk.f32.gmra.mxu2 %vm425_vm2, %v5291_v40 }
 0x1cc   : > { %v2192_v0 = vmax.f32 %v2176_v37, 0.0  ;;  %4091 = vmatmul.msk.f32.gmra.mxu0 %vm425_vm2, %v5335_v33  ;;  %v2697_v37 = vsel %vm4458_vm5, %v5351_v27, 0.0 }
 0x1cd   : > { %v1956_v48 = vpop.f32.mrf.mxu3  ;;  %v5349_v19 = vpop.f32.mrf.mxu1 }
 0x1ce   : > { %v1810_v29 = vpop.f32.mrf.mxu2  ;;  %2209 = vst.msk [vmem:[%s4374_s19 + $0x48] sm:$0xff] %vm2203_vm9, %v2192_v0  ;;  %v1992_v60 = vadd.f32 %v1956_v48, %v1843_v36 }
 0x1cf   : > { %6000 = vst [vmem:[#allocation22_spill] sm:$0xff] %v5349_v19  ;;  %v1844_v0 = vadd.f32 %v1810_v29, %v5095_v59 }
 0x1d0   : > { %v2157_v14 = vadd.f32 %v2121_v4, %v1992_v60  ;;  %4108 = vmatmul.msk.f32.gmra.mxu1 %vm425_vm2, %v5102_v3 }
 0x1d1   : > { %v2127_v13 = vpop.f32.mrf.mxu0 }
 0x1d2   : > { %v2177_v36 = vadd.f32 %v5214_v22, %v2157_v14  ;;  %4074 = vmatmul.msk.f32.gmra.mxu3 %vm425_vm2, %v2529_v62  ;;  %v5377_v62 = vld [vmem:[#allocation2 + $0x5f] sm:$0xff] }
 0x1d3   : > { %4058 = vmatmul.msk.f32.gmra.mxu2 %vm425_vm2, %v2244_v46 }
 0x1d4   : > { %v2193_v48 = vmax.f32 %v2177_v36, 0.0  ;;  %4092 = vmatmul.msk.f32.gmra.mxu0 %vm425_vm2, %v2697_v37  ;;  %v5385_v36 = vld [vmem:[#allocation2 + $0x51] sm:$0xff] }
 0x1d5   : > { %v1959_v60 = vpop.f32.mrf.mxu3  ;;  %v5371_v19 = vpop.f32.mrf.mxu1 }
 0x1d6   : > { %v1813_v4 = vpop.f32.mrf.mxu2  ;;  %2210 = vst.msk [vmem:[%s4374_s19 + $0x60] sm:$0xff] %vm2203_vm9, %v2193_v48  ;;  %v1993_v3 = vadd.f32 %v1959_v60, %v1844_v0  ;;  %v5393_v60 = vld [vmem:[#allocation2 + $0x67] sm:$0xff] }
 0x1d7   : > { %v1845_v29 = vadd.f32 %v1813_v4, %v5110_v31  ;;  %v2246_v31 = vsel %vm4504_vm7, %v5351_v27, 0.0  ;;  %v2531_v4 = vsel %vm4776_vm0, %v5385_v36, 0.0 }
 0x1d8   : > { %v2158_v14 = vadd.f32 %v2124_v8, %v1993_v3  ;;  %4109 = vmatmul.msk.f32.gmra.mxu1 %vm425_vm2, %v5117_v11 }
 0x1d9   : > { %v2130_v46 = vpop.f32.mrf.mxu0 }
 0x1da   : > { %v2178_v59 = vadd.f32 %v5214_v22, %v2158_v14  ;;  %4075 = vmatmul.msk.f32.gmra.mxu3 %vm425_vm2, %v5373_v10 }
 0x1db   : > { %4059 = vmatmul.msk.f32.gmra.mxu2 %vm425_vm2, %v5335_v33 }
 0x1dc   : > { %v2194_v37 = vmax.f32 %v2178_v59, 0.0  ;;  %4093 = vmatmul.msk.f32.gmra.mxu0 %vm425_vm2, %v5377_v62  ;;  %v2699_v59 = vsel %vm4504_vm7, %v5393_v60, 0.0 }
 0x1dd   : > { %v1962_v8 = vpop.f32.mrf.mxu3  ;;  %v5391_v48 = vpop.f32.mrf.mxu1 }
 0x1de   : > { %v1816_v11 = vpop.f32.mrf.mxu2  ;;  %2211 = vst.msk [vmem:[%s4374_s19 + $0x68] sm:$0xff] %vm2203_vm9, %v2194_v37  ;;  %v1994_v0 = vadd.f32 %v1962_v8, %v1845_v29 }
 0x1df   : > { %6001 = vst [vmem:[#allocation15_spill] sm:$0xff] %v5391_v48  ;;  %v1846_v37 = vadd.f32 %v1816_v11, %v5125_v18 }
 0x1e0   : > { %v2159_v3 = vadd.f32 %v2127_v13, %v1994_v0  ;;  %4110 = vmatmul.msk.f32.gmra.mxu1 %vm425_vm2, %v5132_v32 }
 0x1e1   : > { %v2133_v14 = vpop.f32.mrf.mxu0 }
 0x1e2   : > { %v2179_v29 = vadd.f32 %v5214_v22, %v2159_v3  ;;  %4076 = vmatmul.msk.f32.gmra.mxu3 %vm425_vm2, %v2531_v4  ;;  %v5419_v4 = vld [vmem:[#allocation2 + $0x6f] sm:$0xff] }
 0x1e3   : > { %4060 = vmatmul.msk.f32.gmra.mxu2 %vm425_vm2, %v2246_v31 }
 0x1e4   : > { %v2195_v8 = vmax.f32 %v2179_v29, 0.0  ;;  %4094 = vmatmul.msk.f32.gmra.mxu0 %vm425_vm2, %v2699_v59  ;;  %v5427_v29 = vld [vmem:[#allocation2 + $0x61] sm:$0xff] }
 0x1e5   : > { %v1965_v0 = vpop.f32.mrf.mxu3  ;;  %v5413_v48 = vpop.f32.mrf.mxu1 }
 0x1e6   : > { %v1819_v13 = vpop.f32.mrf.mxu2  ;;  %2212 = vst.msk [vmem:[%s4374_s19 + $0x80] sm:$0xff] %vm2203_vm9, %v2195_v8  ;;  %v1995_v32 = vadd.f32 %v1965_v0, %v1846_v37  ;;  %v5435_v0 = vld [vmem:[#allocation2 + $0x77] sm:$0xff] }
 0x1e7   : > { %v1847_v11 = vadd.f32 %v1819_v13, %v5140_v21  ;;  %v2248_v21 = vsel %vm5981_vm4, %v5393_v60, 0.0  ;;  %v2533_v13 = vsel %vm4817_vm1, %v5427_v29, 0.0 }
 0x1e8   : > { %v2160_v3 = vadd.f32 %v2130_v46, %v1995_v32  ;;  %4111 = vmatmul.msk.f32.gmra.mxu1 %vm425_vm2, %v5147_v51 }
 0x1e9   : > { %v2136_v31 = vpop.f32.mrf.mxu0 }
 0x1ea   : > { %v2180_v18 = vadd.f32 %v5214_v22, %v2160_v3  ;;  %4077 = vmatmul.msk.f32.gmra.mxu3 %vm425_vm2, %v5415_v25 }
 0x1eb   : > { %4061 = vmatmul.msk.f32.gmra.mxu2 %vm425_vm2, %v5377_v62 }
 0x1ec   : > { %v2196_v59 = vmax.f32 %v2180_v18, 0.0  ;;  %4095 = vmatmul.msk.f32.gmra.mxu0 %vm425_vm2, %v5419_v4  ;;  %v2701_v18 = vsel %vm5981_vm4, %v5435_v0, 0.0 }
 0x1ed   : > { %v1968_v46 = vpop.f32.mrf.mxu3  ;;  %v5433_v8 = vpop.f32.mrf.mxu1 }
 0x1ee   : > { %v1822_v51 = vpop.f32.mrf.mxu2  ;;  %2213 = vst.msk [vmem:[%s4374_s19 + $0x88] sm:$0xff] %vm2203_vm9, %v2196_v59  ;;  %v1996_v37 = vadd.f32 %v1968_v46, %v1847_v11 }
 0x1ef   : > { %6002 = vst [vmem:[#allocation10_spill] sm:$0xff] %v5433_v8  ;;  %v1848_v59 = vadd.f32 %v1822_v51, %v5155_v39 }
 0x1f0   : > { %v2161_v32 = vadd.f32 %v2133_v14, %v1996_v37  ;;  %4112 = vmatmul.msk.f32.gmra.mxu1 %vm425_vm2, %v5162_v56 }
 0x1f1   : > { %v2139_v3 = vpop.f32.mrf.mxu0 }
 0x1f2   : > { %v2181_v11 = vadd.f32 %v5214_v22, %v2161_v32  ;;  %4078 = vmatmul.msk.f32.gmra.mxu3 %vm425_vm2, %v2533_v13  ;;  %v5461_v13 = vld [vmem:[#allocation2 + $0x7f] sm:$0xff] }
 0x1f3   : > { %4062 = vmatmul.msk.f32.gmra.mxu2 %vm425_vm2, %v2248_v21 }
 0x1f4   : > { %v2197_v46 = vmax.f32 %v2181_v11, 0.0  ;;  %4096 = vmatmul.msk.f32.gmra.mxu0 %vm425_vm2, %v2701_v18  ;;  %v5469_v11 = vld [vmem:[#allocation2 + $0x71] sm:$0xff] }
 0x1f5   : > { %v1971_v37 = vpop.f32.mrf.mxu3  ;;  %v5455_v8 = vpop.f32.mrf.mxu1 }
 0x1f6   : > { %v1825_v14 = vpop.f32.mrf.mxu2  ;;  %2214 = vst.msk [vmem:[%s4374_s19 + $0xa0] sm:$0xff] %vm2203_vm9, %v2197_v46  ;;  %v1997_v56 = vadd.f32 %v1971_v37, %v1848_v59  ;;  %v5477_v37 = vld [vmem:[#allocation2 + $0x87] sm:$0xff] }
 0x1f7   : > { %v1849_v51 = vadd.f32 %v1825_v14, %v5169_v7  ;;  %v2250_v7 = vsel %vm4596_vm11, %v5435_v0, 0.0  ;;  %v2535_v14 = vsel %vm6004_vm6, %v5469_v11, 0.0 }
 0x1f8   : > { %v2162_v32 = vadd.f32 %v2136_v31, %v1997_v56  ;;  %4113 = vmatmul.msk.f32.gmra.mxu1 %vm425_vm2, %v5175_v30 }
 0x1f9   : > { %v2142_v21 = vpop.f32.mrf.mxu0 }
 0x1fa   : > { %v2182_v39 = vadd.f32 %v5214_v22, %v2162_v32  ;;  %4079 = vmatmul.msk.f32.gmra.mxu3 %vm425_vm2, %v5457_v17 }
 0x1fb   : > { %4063 = vmatmul.msk.f32.gmra.mxu2 %vm425_vm2, %v5419_v4 }
 0x1fc   : > { %v2198_v18 = vmax.f32 %v2182_v39, 0.0  ;;  %4097 = vmatmul.msk.f32.gmra.mxu0 %vm425_vm2, %v5461_v13  ;;  %v2703_v39 = vsel %vm4596_vm11, %v5477_v37, 0.0  ;;  %vm6008_vm11 = vnez %v5993_v1 }
 0x1fd   : > { %v1974_v31 = vpop.f32.mrf.mxu3  ;;  %v5475_v46 = vpop.f32.mrf.mxu1 }
 0x1fe   : > { %v1828_v30 = vpop.f32.mrf.mxu2  ;;  %2215 = vst.msk [vmem:[%s4374_s19 + $0xa8] sm:$0xff] %vm2203_vm9, %v2198_v18  ;;  %v1998_v59 = vadd.f32 %v1974_v31, %v1849_v51 }
 0x1ff   : > { %6003 = vst [vmem:[#allocation25_spill] sm:$0xff] %v5475_v46  ;;  %v1850_v18 = vadd.f32 %v1828_v30, %v5182_v16  ;;  %v5495_v46 = vld [vmem:[#allocation2 + $0x88] sm:$0xff] }
 0x200   : > { %v2163_v56 = vadd.f32 %v2139_v3, %v1998_v59  ;;  %4114 = vmatmul.msk.f32.gmra.mxu1 %vm425_vm2, %v5187_v26  ;;  %v5505_v30 = vld [vmem:[#allocation2 + $0x8f] sm:$0xff] }
 0x201   : > { %v2145_v32 = vpop.f32.mrf.mxu0 }
 0x202   : > { %v2183_v51 = vadd.f32 %v5214_v22, %v2163_v56  ;;  %4080 = vmatmul.msk.f32.gmra.mxu3 %vm425_vm2, %v2535_v14  ;;  %v5501_v56 = vld [vmem:[#allocation2 + $0x79] sm:$0xff] }
 0x203   : > { %4064 = vmatmul.msk.f32.gmra.mxu2 %vm425_vm2, %v2250_v7 }
 0x204   : > { %v2199_v31 = vmax.f32 %v2183_v51, 0.0  ;;  %4098 = vmatmul.msk.f32.gmra.mxu0 %vm425_vm2, %v2703_v39 }
 0x205   : > { %v1977_v59 = vpop.f32.mrf.mxu3  ;;  %v5499_v6 = vpop.f32.mrf.mxu1 }
 0x206   : > { %v1831_v3 = vpop.f32.mrf.mxu2  ;;  %2216 = vst.msk [vmem:[%s4374_s19 + $0xc0] sm:$0xff] %vm2203_vm9, %v2199_v31  ;;  %v1999_v26 = vadd.f32 %v1977_v59, %v1850_v18  ;;  %v5513_v18 = vld [vmem:[#allocation2 + $0x81] sm:$0xff]  ;;  %v5517_v59 = vld [vmem:[#allocation2 + $0x90] sm:$0xff] }
 0x207   : > { %6005 = vst [vmem:[#allocation18_spill] sm:$0xff] %v5499_v6  ;;  %v1851_v39 = vadd.f32 %v1831_v3, %v5196_v15  ;;  %v2537_v15 = vsel %vm6007_vm3, %v5513_v18, 0.0  ;;  %v4251_v3 = vld [vmem:[%s5831_s4] ss:$0 sm:$0xff] }
 0x208   : > { %v2164_v7 = vadd.f32 %v2142_v21, %v1999_v26  ;;  %4115 = vmatmul.msk.f32.gmra.mxu1 %vm425_vm2, %v5495_v46  ;;  %3646 = vrot.lane.b32.xlu0 %v4251_v3, %s4294_s26 }
 0x209   : > { %v2148_v16 = vpop.f32.mrf.mxu0 }
 0x20a   : > { %v2184_v14 = vadd.f32 %v5214_v22, %v2164_v7  ;;  %4081 = vmatmul.msk.f32.gmra.mxu3 %vm425_vm2, %v5501_v56 }
 0x20b   : > { %4065 = vmatmul.msk.f32.gmra.mxu2 %vm425_vm2, %v5461_v13 }
 0x20c   : > { %v2200_v51 = vmax.f32 %v2184_v14, 0.0  ;;  %4099 = vmatmul.msk.f32.gmra.mxu0 %vm425_vm2, %v5505_v30 }
 0x20d   : > { %v1980_v31 = vpop.f32.mrf.mxu3  ;;  %v5521_v7 = vpop.f32.mrf.mxu1 }
 0x20e   : > { %v1834_v21 = vpop.f32.mrf.mxu2  ;;  %2217 = vst.msk [vmem:[%s4374_s19 + $0xc8] sm:$0xff] %vm2203_vm9, %v2200_v51  ;;  %v2000_v26 = vadd.f32 %v1980_v31, %v1851_v39 }
 0x20f   : > { %6006 = vst [vmem:[#allocation13_spill] sm:$0xff] %v5521_v7  ;;  %v1852_v51 = vadd.f32 %v1834_v21, %v5205_v5 }
 0x210   : > { %v2165_v14 = vadd.f32 %v2145_v32, %v2000_v26  ;;  %4116 = vmatmul.msk.f32.gmra.mxu1 %vm425_vm2, %v5517_v59 }
 0x211   : > { %v2776_v6 = vpop.f32.mrf.mxu0 }
 0x212   : > { %v2185_v39 = vadd.f32 %v5214_v22, %v2165_v14  ;;  %4082 = vmatmul.msk.f32.gmra.mxu3 %vm425_vm2, %v2537_v15  ;;  %v3008_v15 = vsel %vm4634_vm12, %v5253_v54, 0.0 }
 0x213   : > { %4118 = vmatmul.msk.f32.vlgmr.msra.gmra.mxu2 %vm425_vm2, %v5240_v55  ;;  %v3174_v55 = vsel %vm6008_vm11, %v5218_v43, 0.0  ;;  %v3493_v43 = vsel %vm4634_vm12, %v5299_v2, 0.0  ;;  %vm6009_vm11 = vnez %v5899_v50  ;;  %v3495_v50 = vsel %vm4665_vm13, %v5343_v53, 0.0 }
 0x214   : > { %v2201_v31 = vmax.f32 %v2185_v39, 0.0  ;;  %4152 = vmatmul.msk.f32.vlgmr.msra.gmra.mxu0 %vm425_vm2, %v5234_v63 }
 0x215   : > { %v1983_v32 = vpop.f32.mrf.mxu3  ;;  %v2927_v3 = vpop.f32.mrf.mxu1 }
 0x216   : > { %v2458_v26 = vpop.f32.mrf.mxu2  ;;  %2218 = vst.msk [vmem:[%s4374_s19 + $0xe0] sm:$0xff] %vm2203_vm9, %v2201_v31  ;;  %v2001_v7 = vadd.f32 %v1983_v32, %v1852_v51 }
 0x217   : > { %v2459_v14 = vadd.f32 %v2458_v26, %v5201_v44  ;;  %v3010_v26 = vsel %vm4665_vm13, %v5299_v2, 0.0 }
 0x218   : > { %v2166_v5 = vadd.f32 %v2148_v16, %v2001_v7  ;;  %4169 = vmatmul.msk.f32.vlgmr.msra.gmra.mxu1 %vm425_vm2, %v5287_v58 }
 0x219   : > { %v2779_v63 = vpop.f32.mrf.mxu0 }
 0x21a   : > { %v2186_v21 = vadd.f32 %v5214_v22, %v2166_v5  ;;  %4135 = vmatmul.msk.f32.vlgmr.msra.gmra.mxu3 %vm425_vm2, %v3174_v55 }
 0x21b   : > { %4119 = vmatmul.msk.f32.gmra.mxu2 %vm425_vm2, %v3008_v15 }
 0x21c   : > { %v2202_v39 = vmax.f32 %v2186_v21, 0.0  ;;  %4153 = vmatmul.msk.f32.gmra.mxu0 %vm425_vm2, %v5257_v34  ;;  %v3329_v21 = vld [vmem:[#allocation2 + $0x48] sm:$0xff] }
 0x21d   : > { %v2609_v1 = vpop.f32.mrf.mxu3  ;;  %v2930_v22 = vpop.f32.mrf.mxu1 }
 0x21e   : > { %v2461_v54 = vpop.f32.mrf.mxu2  ;;  %2219 = vst.msk [vmem:[%s4374_s19 + $0xe8] sm:$0xff] %vm2203_vm9, %v2202_v39  ;;  %v2657_v16 = vadd.f32 %v2609_v1, %v2459_v14 }
 0x21f   : > { %v2462_v44 = vadd.f32 %v2461_v54, %v5216_v35 }
 0x220   : > { %v2824_v7 = vadd.f32 %v2776_v6, %v2657_v16  ;;  %4170 = vmatmul.msk.f32.gmra.mxu1 %vm425_vm2, %v3493_v43  ;;  %v3012_v16 = vsel %vm4707_vm14, %v5343_v53, 0.0 }
 0x221   : > { %v2782_v51 = vpop.f32.mrf.mxu0 }
 0x222   : > { %v5561_v31 = vadd.f32 %v2927_v3, %v2824_v7  ;;  %4136 = vmatmul.msk.f32.gmra.mxu3 %vm425_vm2, %v5245_v45  ;;  %v3178_v7 = vsel %vm4544_vm8, %v5309_v49, 0.0  ;;  %v3497_v49 = vsel %vm4707_vm14, %v5385_v36, 0.0 }
 0x223   : > { %4120 = vmatmul.msk.f32.gmra.mxu2 %vm425_vm2, %v5287_v58  ;;  %v3176_v58 = vsel %vm6009_vm11, %v5263_v24, 0.0 }
 0x224   : > { %4154 = vmatmul.msk.f32.gmra.mxu0 %vm425_vm2, %v5281_v38 }
 0x225   : > { %v2612_v34 = vpop.f32.mrf.mxu3  ;;  %v2933_v6 = vpop.f32.mrf.mxu1 }
 0x226   : > { %v2464_v42 = vpop.f32.mrf.mxu2  ;;  %v2658_v32 = vadd.f32 %v2612_v34, %v2462_v44 }
 0x227   : > { %v2465_v38 = vadd.f32 %v2464_v42, %v5238_v28  ;;  %v6010_v28 = vld [vmem:[#allocation9_spill] sm:$0xff]  ;;  %v6013_v42 = vld [vmem:[#allocation23_spill] sm:$0xff] }
 0x228   : > { %v2825_v3 = vadd.f32 %v2779_v63, %v2658_v32  ;;  %4171 = vmatmul.msk.f32.gmra.mxu1 %vm425_vm2, %v5331_v20 }
 0x229   : > { %v2785_v35 = vpop.f32.mrf.mxu0 }
 0x22a   : > { %v5578_v45 = vadd.f32 %v2930_v22, %v2825_v3  ;;  %4137 = vmatmul.msk.f32.gmra.mxu3 %vm425_vm2, %v3176_v58 }
 0x22b   : > { %4121 = vmatmul.msk.f32.gmra.mxu2 %vm425_vm2, %v3010_v26 }
 0x22c   : > { %4155 = vmatmul.msk.f32.gmra.mxu0 %vm425_vm2, %v5303_v41 }
 0x22d   : > { %v2615_v15 = vpop.f32.mrf.mxu3  ;;  %v2936_v55 = vpop.f32.mrf.mxu1 }
 0x22e   : > { %v2467_v2 = vpop.f32.mrf.mxu2  ;;  %v2659_v24 = vadd.f32 %v2615_v15, %v2465_v38 }
 0x22f   : > { %v2468_v41 = vadd.f32 %v2467_v2, %v6010_v28  ;;  %v6014_v2 = vld [vmem:[#allocation26_spill] sm:$0xff]  ;;  %v3180_v28 = vsel %vm4590_vm10, %v5351_v27, 0.0  ;;  %v3499_v27 = vsel %vm4739_vm15, %v5427_v29, 0.0 }
 0x230   : > { %v2826_v5 = vadd.f32 %v2782_v51, %v2659_v24  ;;  %4172 = vmatmul.msk.f32.gmra.mxu1 %vm425_vm2, %v3495_v50  ;;  %v3330_v51 = vld [vmem:[#allocation2 + $0x50] sm:$0xff] }
 0x231   : > { %v2788_v63 = vpop.f32.mrf.mxu0 }
 0x232   : > { %v5589_v14 = vadd.f32 %v2933_v6, %v2826_v5  ;;  %4138 = vmatmul.msk.f32.gmra.mxu3 %vm425_vm2, %v5291_v40 }
 0x233   : > { %4122 = vmatmul.msk.f32.gmra.mxu2 %vm425_vm2, %v5331_v20 }
 0x234   : > { %4156 = vmatmul.msk.f32.gmra.mxu0 %vm425_vm2, %v3329_v21 }
 0x235   : > { %v2618_v39 = vpop.f32.mrf.mxu3  ;;  %v2939_v1 = vpop.f32.mrf.mxu1 }
 0x236   : > { %v2470_v61 = vpop.f32.mrf.mxu2  ;;  %v2660_v54 = vadd.f32 %v2618_v39, %v2468_v41  ;;  %v3332_v41 = vld [vmem:[#allocation2 + $0x60] sm:$0xff] }
 0x237   : > { %v2471_v34 = vadd.f32 %v2470_v61, %v6013_v42 }
 0x238   : > { %v2827_v20 = vadd.f32 %v2785_v35, %v2660_v54  ;;  %4173 = vmatmul.msk.f32.gmra.mxu1 %vm425_vm2, %v5373_v10  ;;  %v3331_v35 = vld [vmem:[#allocation2 + $0x58] sm:$0xff] }
 0x239   : > { %v2791_v40 = vpop.f32.mrf.mxu0 }
 0x23a   : > { %v5605_v44 = vadd.f32 %v2936_v55, %v2827_v20  ;;  %4139 = vmatmul.msk.f32.gmra.mxu3 %vm425_vm2, %v3178_v7  ;;  %v3333_v7 = vld [vmem:[#allocation2 + $0x68] sm:$0xff] }
 0x23b   : > { %4123 = vmatmul.msk.f32.gmra.mxu2 %vm425_vm2, %v3012_v16 }
 0x23c   : > { %4157 = vmatmul.msk.f32.gmra.mxu0 %vm425_vm2, %v3330_v51 }
 0x23d   : > { %v2621_v32 = vpop.f32.mrf.mxu3  ;;  %v2942_v26 = vpop.f32.mrf.mxu1 }
 0x23e   : > { %v2473_v53 = vpop.f32.mrf.mxu2  ;;  %v2661_v6 = vadd.f32 %v2621_v32, %v2471_v34 }
 0x23f   : > { %v2474_v15 = vadd.f32 %v2473_v53, %v6014_v2  ;;  %v3016_v53 = vsel %vm4776_vm0, %v5427_v29, 0.0 }
 0x240   : > { %v2828_v58 = vadd.f32 %v2788_v63, %v2661_v6  ;;  %4174 = vmatmul.msk.f32.gmra.mxu1 %vm425_vm2, %v3497_v49  ;;  %v3014_v63 = vsel %vm4739_vm15, %v5385_v36, 0.0  ;;  %v3182_v49 = vsel %vm4458_vm5, %v5393_v60, 0.0  ;;  %v3334_v6 = vld [vmem:[#allocation2 + $0x70] sm:$0xff]  ;;  %v3501_v60 = vsel %vm4776_vm0, %v5469_v11, 0.0 }
 0x241   : > { %v2794_v3 = vpop.f32.mrf.mxu0 }
 0x242   : > { %v5615_v38 = vadd.f32 %v2939_v1, %v2828_v58  ;;  %4140 = vmatmul.msk.f32.gmra.mxu3 %vm425_vm2, %v5335_v33 }
 0x243   : > { %4124 = vmatmul.msk.f32.gmra.mxu2 %vm425_vm2, %v5373_v10 }
 0x244   : > { %4158 = vmatmul.msk.f32.gmra.mxu0 %vm425_vm2, %v3331_v35 }
 0x245   : > { %v2624_v24 = vpop.f32.mrf.mxu3  ;;  %v2945_v5 = vpop.f32.mrf.mxu1 }
 0x246   : > { %v2476_v50 = vpop.f32.mrf.mxu2  ;;  %v2662_v55 = vadd.f32 %v2624_v24, %v2474_v15  ;;  %v3335_v24 = vld [vmem:[#allocation2 + $0x78] sm:$0xff] }
 0x247   : > { %v2477_v39 = vadd.f32 %v2476_v50, %v5329_v12  ;;  %v6016_v12 = vld [vmem:[#allocation22_spill] sm:$0xff] }
 0x248   : > { %v2829_v10 = vadd.f32 %v2791_v40, %v2662_v55  ;;  %4175 = vmatmul.msk.f32.gmra.mxu1 %vm425_vm2, %v5415_v25 }
 0x249   : > { %v2797_v33 = vpop.f32.mrf.mxu0 }
 0x24a   : > { %v5631_v61 = vadd.f32 %v2942_v26, %v2829_v10  ;;  %4141 = vmatmul.msk.f32.gmra.mxu3 %vm425_vm2, %v3180_v28  ;;  %v3018_v10 = vsel %vm4817_vm1, %v5469_v11, 0.0 }
 0x24b   : > { %4125 = vmatmul.msk.f32.gmra.mxu2 %vm425_vm2, %v3014_v63 }
 0x24c   : > { %4159 = vmatmul.msk.f32.gmra.mxu0 %vm425_vm2, %v3332_v41  ;;  %v3184_v41 = vsel %vm4504_vm7, %v5435_v0, 0.0  ;;  %v3503_v0 = vsel %vm4817_vm1, %v5513_v18, 0.0 }
 0x24d   : > { %v2627_v54 = vpop.f32.mrf.mxu3  ;;  %v2948_v43 = vpop.f32.mrf.mxu1 }
 0x24e   : > { %v2479_v36 = vpop.f32.mrf.mxu2  ;;  %v2663_v1 = vadd.f32 %v2627_v54, %v2477_v39  ;;  %v3336_v39 = vld [vmem:[#allocation2 + $0x80] sm:$0xff] }
 0x24f   : > { %v2480_v40 = vadd.f32 %v2479_v36, %v6016_v12 }
 0x250   : > { %v2830_v16 = vadd.f32 %v2794_v3, %v2663_v1  ;;  %4176 = vmatmul.msk.f32.gmra.mxu1 %vm425_vm2, %v3499_v27 }
 0x251   : > { %v2800_v22 = vpop.f32.mrf.mxu0 }
 0x252   : > { %v5641_v20 = vadd.f32 %v2945_v5, %v2830_v16  ;;  %4142 = vmatmul.msk.f32.gmra.mxu3 %vm425_vm2, %v5377_v62 }
 0x253   : > { %4126 = vmatmul.msk.f32.gmra.mxu2 %vm425_vm2, %v5415_v25 }
 0x254   : > { %4160 = vmatmul.msk.f32.gmra.mxu0 %vm425_vm2, %v3333_v7 }
 0x255   : > { %v2630_v51 = vpop.f32.mrf.mxu3  ;;  %v2951_v34 = vpop.f32.mrf.mxu1 }
 0x256   : > { %v2482_v52 = vpop.f32.mrf.mxu2  ;;  %v2664_v42 = vadd.f32 %v2630_v51, %v2480_v40 }
 0x257   : > { %v2483_v58 = vadd.f32 %v2482_v52, %v5371_v19  ;;  %v6018_v19 = vld [vmem:[#allocation15_spill] sm:$0xff] }
 0x258   : > { %v2831_v25 = vadd.f32 %v2797_v33, %v2664_v42  ;;  %4177 = vmatmul.msk.f32.gmra.mxu1 %vm425_vm2, %v5457_v17  ;;  %v3020_v42 = vsel %vm6004_vm6, %v5513_v18, 0.0  ;;  %v3491_v33 = vld [vmem:[#allocation2 + $0xa1] sm:$0xff] }
 0x259   : > { %v2803_v62 = vpop.f32.mrf.mxu0 }
 0x25a   : > { %v5657_v26 = vadd.f32 %v2948_v43, %v2831_v25  ;;  %4143 = vmatmul.msk.f32.gmra.mxu3 %vm425_vm2, %v3182_v49  ;;  %v3006_v25 = vld [vmem:[#allocation2 + $0x91] sm:$0xff] }
 0x25b   : > { %4127 = vmatmul.msk.f32.gmra.mxu2 %vm425_vm2, %v3016_v53  ;;  %v3005_v53 = vld [vmem:[#allocation2 + $0x89] sm:$0xff] }
 0x25c   : > { %4161 = vmatmul.msk.f32.gmra.mxu0 %vm425_vm2, %v3334_v6 }
 0x25d   : > { %v2633_v3 = vpop.f32.mrf.mxu3  ;;  %v2954_v2 = vpop.f32.mrf.mxu1 }
 0x25e   : > { %v2485_v29 = vpop.f32.mrf.mxu2  ;;  %v2665_v35 = vadd.f32 %v2633_v3, %v2483_v58 }
 0x25f   : > { %v2486_v5 = vadd.f32 %v2485_v29, %v6018_v19 }
 0x260   : > { %v2832_v15 = vadd.f32 %v2800_v22, %v2665_v35  ;;  %4178 = vmatmul.msk.f32.gmra.mxu1 %vm425_vm2, %v3501_v60  ;;  %v3339_v60 = vld [vmem:[#allocation2 + $0x98] sm:$0xff] }
 0x261   : > { %v2806_v50 = vpop.f32.mrf.mxu0 }
 0x262   : > { %v5667_v55 = vadd.f32 %v2951_v34, %v2832_v15  ;;  %4144 = vmatmul.msk.f32.gmra.mxu3 %vm425_vm2, %v5419_v4 }
 0x263   : > { %4128 = vmatmul.msk.f32.gmra.mxu2 %vm425_vm2, %v5457_v17 }
 0x264   : > { %4162 = vmatmul.msk.f32.gmra.mxu0 %vm425_vm2, %v3335_v24 }
 0x265   : > { %v2636_v63 = vpop.f32.mrf.mxu3  ;;  %v2957_v28 = vpop.f32.mrf.mxu1 }
 0x266   : > { %v2488_v23 = vpop.f32.mrf.mxu2  ;;  %v2666_v21 = vadd.f32 %v2636_v63, %v2486_v5  ;;  %v3022_v5 = vsel %vm6007_vm3, %v3006_v25, 0.0 }
 0x267   : > { %v2489_v54 = vadd.f32 %v2488_v23, %v5413_v48  ;;  %v6020_v48 = vld [vmem:[#allocation10_spill] sm:$0xff]  ;;  %v6023_v23 = vld [vmem:[#allocation17_spill] sm:$0xff] }
 0x268   : > { %v2833_v17 = vadd.f32 %v2803_v62, %v2666_v21  ;;  %4179 = vmatmul.msk.f32.gmra.mxu1 %vm425_vm2, %v5501_v56  ;;  %vm6024_vm5 = vnez %v6023_v23 }
 0x269   : > { %v2809_v4 = vpop.f32.mrf.mxu0 }
 0x26a   : > { %v5683_v36 = vadd.f32 %v2954_v2, %v2833_v17  ;;  %4145 = vmatmul.msk.f32.gmra.mxu3 %vm425_vm2, %v3184_v41  ;;  %v3172_v2 = vld [vmem:[#allocation2 + $0x97] sm:$0xff] }
 0x26b   : > { %4129 = vmatmul.msk.f32.gmra.mxu2 %vm425_vm2, %v3018_v10  ;;  %v3188_v63 = vsel %vm6024_vm5, %v3172_v2, 0.0  ;;  %v6025_v41 = vld [vmem:[#allocation18_spill] sm:$0xff] }
 0x26c   : > { %4163 = vmatmul.msk.f32.gmra.mxu0 %vm425_vm2, %v3336_v39 }
 0x26d   : > { %v2639_v27 = vpop.f32.mrf.mxu3  ;;  %v2960_v43 = vpop.f32.mrf.mxu1 }
 0x26e   : > { %v2491_v11 = vpop.f32.mrf.mxu2  ;;  %v2667_v1 = vadd.f32 %v2639_v27, %v2489_v54  ;;  %v3507_v54 = vsel %vm6007_vm3, %v3491_v33, 0.0 }
 0x26f   : > { %v2492_v12 = vadd.f32 %v2491_v11, %v6020_v48 }
 0x270   : > { %v2834_v16 = vadd.f32 %v2806_v50, %v2667_v1  ;;  %4180 = vmatmul.msk.f32.gmra.mxu1 %vm425_vm2, %v3503_v0  ;;  %v3490_v50 = vld [vmem:[#allocation2 + $0x99] sm:$0xff] }
 0x271   : > { %v2812_v22 = vpop.f32.mrf.mxu0  ;;  %v3173_v0 = vld [vmem:[#allocation2 + $0x9f] sm:$0xff] }
 0x272   : > { %v5693_v7 = vadd.f32 %v2957_v28, %v2834_v16  ;;  %4146 = vmatmul.msk.f32.gmra.mxu3 %vm425_vm2, %v5461_v13  ;;  %v3340_v28 = vld [vmem:[#allocation2 + $0xa0] sm:$0xff] }
 0x273   : > { %4130 = vmatmul.msk.f32.gmra.mxu2 %vm425_vm2, %v5501_v56  ;;  %v3186_v56 = vsel %vm5981_vm4, %v5477_v37, 0.0  ;;  %v3505_v37 = vsel %vm6004_vm6, %v3006_v25, 0.0 }
 0x274   : > { %4164 = vmatmul.msk.f32.gmra.mxu0 %vm425_vm2, %v5495_v46 }
 0x275   : > { %v2642_v40 = vpop.f32.mrf.mxu3  ;;  %v2963_v51 = vpop.f32.mrf.mxu1 }
 0x276   : > { %v2494_v57 = vpop.f32.mrf.mxu2  ;;  %v2668_v52 = vadd.f32 %v2642_v40, %v2492_v12 }
 0x277   : > { %v2495_v46 = vadd.f32 %v2494_v57, %v5455_v8  ;;  %v6022_v8 = vld [vmem:[#allocation25_spill] sm:$0xff] }
 0x278   : > { %v2835_v32 = vadd.f32 %v2809_v4, %v2668_v52  ;;  %4181 = vmatmul.msk.f32.gmra.mxu1 %vm425_vm2, %v3005_v53 }
 0x279   : > { %v2815_v13 = vpop.f32.mrf.mxu0 }
 0x27a   : > { %v5709_v49 = vadd.f32 %v2960_v43, %v2835_v32  ;;  %4147 = vmatmul.msk.f32.gmra.mxu3 %vm425_vm2, %v3186_v56  ;;  %v5747_v25 = vpop.permute.xlu0 %3646 }
 0x27b   : > { %4131 = vmatmul.msk.f32.gmra.mxu2 %vm425_vm2, %v3020_v42 }
 0x27c   : > { %4165 = vmatmul.msk.f32.gmra.mxu0 %vm425_vm2, %v5517_v59 }
 0x27d   : > { %v2645_v62 = vpop.f32.mrf.mxu3  ;;  %v2966_v58 = vpop.f32.mrf.mxu1 }
 0x27e   : > { %v2497_v18 = vpop.f32.mrf.mxu2  ;;  %v2669_v6 = vadd.f32 %v2645_v62, %v2495_v46 }
 0x27f   : > { %v2498_v59 = vadd.f32 %v2497_v18, %v6022_v8 }
 0x280   : > { %v2836_v29 = vadd.f32 %v2812_v22, %v2669_v6  ;;  %4182 = vmatmul.msk.f32.gmra.mxu1 %vm425_vm2, %v3505_v37  ;;  %v6026_v22 = vld [vmem:[#allocation13_spill] sm:$0xff] }
 0x281   : > { %v2818_v3 = vpop.f32.mrf.mxu0 }
 0x282   : > { %v5719_v35 = vadd.f32 %v2963_v51, %v2836_v29  ;;  %4148 = vmatmul.msk.f32.gmra.mxu3 %vm425_vm2, %v5505_v30 }
 0x283   : > { %4132 = vmatmul.msk.f32.gmra.mxu2 %vm425_vm2, %v3005_v53 }
 0x284   : > { %4166 = vmatmul.msk.f32.gmra.mxu0 %vm425_vm2, %v3339_v60 }
 0x285   : > { %v2648_v15 = vpop.f32.mrf.mxu3  ;;  %v2969_v19 = vpop.f32.mrf.mxu1 }
 0x286   : > { %v2500_v9 = vpop.f32.mrf.mxu2  ;;  %v2670_v24 = vadd.f32 %v2648_v15, %v2498_v59 }
 0x287   : > { %v2501_v17 = vadd.f32 %v2500_v9, %v6025_v41 }
 0x288   : > { %v2837_v21 = vadd.f32 %v2815_v13, %v2670_v24  ;;  %4183 = vmatmul.msk.f32.gmra.mxu1 %vm425_vm2, %v3490_v50 }
 0x289   : > { %v2821_v30 = vpop.f32.mrf.mxu0 }
 0x28a   : > { %v5731_v10 = vadd.f32 %v2966_v58, %v2837_v21  ;;  %4149 = vmatmul.msk.f32.gmra.mxu3 %vm425_vm2, %v3188_v63 }
 0x28b   : > { %4133 = vmatmul.msk.f32.gmra.mxu2 %vm425_vm2, %v3022_v5 }
 0x28c   : > { %4167 = vmatmul.msk.f32.gmra.mxu0 %vm425_vm2, %v3340_v28 }
 0x28d   : > { %v2651_v39 = vpop.f32.mrf.mxu3  ;;  %v2972_v27 = vpop.f32.mrf.mxu1 }
 0x28e   : > { %v2503_v4 = vpop.f32.mrf.mxu2  ;;  %v2671_v11 = vadd.f32 %v2651_v39, %v2501_v17 }
 0x28f   : > { %v2504_v48 = vadd.f32 %v2503_v4, %v6026_v22 }
 0x290   : > { %v2838_v1 = vadd.f32 %v2818_v3, %v2671_v11  ;;  %4184 = vmatmul.msk.f32.gmra.mxu1 %vm425_vm2, %v3507_v54 }
 0x291   : > { %v3412_v43 = vpop.f32.mrf.mxu0 }
 0x292   : > { %v5740_v16 = vadd.f32 %v2969_v19, %v2838_v1  ;;  %4150 = vmatmul.msk.f32.gmra.mxu3 %vm425_vm2, %v3173_v0 }
 0x295   : > { %v2654_v12 = vpop.f32.mrf.mxu3  ;;  %v3579_v52 = vpop.f32.mrf.mxu1 }
 0x296   : > { %v3094_v57 = vpop.f32.mrf.mxu2  ;;  %v2672_v40 = vadd.f32 %v2654_v12, %v2504_v48 }
 0x297   : > { %v3142_v34 = vadd.f32 %v3094_v57, %v5561_v31 }
 0x298   : > { %v2839_v51 = vadd.f32 %v2821_v30, %v2672_v40 }
 0x299   : > { %v3415_v47 = vpop.f32.mrf.mxu0 }
 0x29a   : > { %v5744_v42 = vadd.f32 %v2972_v27, %v2839_v51 }
 0x29d   : > { %v3261_v53 = vpop.f32.mrf.mxu3  ;;  %v3582_v13 = vpop.f32.mrf.mxu1 }
 0x29e   : > { %v3097_v56 = vpop.f32.mrf.mxu2  ;;  %v3309_v32 = vadd.f32 %v3261_v53, %v3142_v34 }
 0x29f   : > { %v3143_v37 = vadd.f32 %v3097_v56, %v5578_v45 }
 0x2a0   : > { %v3460_v46 = vadd.f32 %v3412_v43, %v3309_v32 }
 0x2a1   : > { %v3418_v18 = vpop.f32.mrf.mxu0 }
 0x2a2   : > { %v3627_v62 = vadd.f32 %v3579_v52, %v3460_v46 }
 0x2a4   : > { %v3649_v6 = vadd.f32 %v5747_v25, %v3627_v62 }
 0x2a5   : > { %v3264_v29 = vpop.f32.mrf.mxu3  ;;  %v3585_v31 = vpop.f32.mrf.mxu1 }
 0x2a6   : > { %v3100_v58 = vpop.f32.mrf.mxu2  ;;  %v3665_v3 = vmax.f32 %v3649_v6, 0.0  ;;  %v3310_v60 = vadd.f32 %v3264_v29, %v3143_v37 }
 0x2a7   : > { %v3144_v9 = vadd.f32 %v3100_v58, %v5589_v14 }
 0x2a8   : > { %4185 = vst.msk [vmem:[%s4374_s19 + $0x10] sm:$0xff] %vm2203_vm9, %v3665_v3  ;;  %v3461_v8 = vadd.f32 %v3415_v47, %v3310_v60 }
 0x2a9   : > { %v3421_v59 = vpop.f32.mrf.mxu0 }
 0x2aa   : > { %v3628_v2 = vadd.f32 %v3582_v13, %v3461_v8 }
 0x2ac   : > { %v3650_v15 = vadd.f32 %v5747_v25, %v3628_v2 }
 0x2ad   : > { %v3267_v45 = vpop.f32.mrf.mxu3  ;;  %v3588_v5 = vpop.f32.mrf.mxu1 }
 0x2ae   : > { %v3103_v50 = vpop.f32.mrf.mxu2  ;;  %v3666_v24 = vmax.f32 %v3650_v15, 0.0  ;;  %v3311_v19 = vadd.f32 %v3267_v45, %v3144_v9 }
 0x2af   : > { %v3145_v30 = vadd.f32 %v3103_v50, %v5605_v44 }
 0x2b0   : > { %4186 = vst.msk [vmem:[%s4374_s19 + $0x18] sm:$0xff] %vm2203_vm9, %v3666_v24  ;;  %v3462_v23 = vadd.f32 %v3418_v18, %v3311_v19 }
 0x2b1   : > { %v3424_v63 = vpop.f32.mrf.mxu0 }
 0x2b2   : > { %v3629_v21 = vadd.f32 %v3585_v31, %v3462_v23 }
 0x2b4   : > { %v3651_v28 = vadd.f32 %v5747_v25, %v3629_v21 }
 0x2b5   : > { %v3270_v14 = vpop.f32.mrf.mxu3  ;;  %v3591_v4 = vpop.f32.mrf.mxu1 }
 0x2b6   : > { %v3106_v33 = vpop.f32.mrf.mxu2  ;;  %v3667_v41 = vmax.f32 %v3651_v28, 0.0  ;;  %v3312_v17 = vadd.f32 %v3270_v14, %v3145_v30 }
 0x2b7   : > { %v3146_v27 = vadd.f32 %v3106_v33, %v5615_v38 }
 0x2b8   : > { %4187 = vst.msk [vmem:[%s4374_s19 + $0x30] sm:$0xff] %vm2203_vm9, %v3667_v41  ;;  %v3463_v39 = vadd.f32 %v3421_v59, %v3312_v17 }
 0x2b9   : > { %v3427_v54 = vpop.f32.mrf.mxu0 }
 0x2ba   : > { %v3630_v11 = vadd.f32 %v3588_v5, %v3463_v39 }
 0x2bc   : > { %v3652_v0 = vadd.f32 %v5747_v25, %v3630_v11 }
 0x2bd   : > { %v3273_v44 = vpop.f32.mrf.mxu3  ;;  %v3594_v48 = vpop.f32.mrf.mxu1 }
 0x2be   : > { %v3109_v1 = vpop.f32.mrf.mxu2  ;;  %v3668_v43 = vmax.f32 %v3652_v0, 0.0  ;;  %v3313_v22 = vadd.f32 %v3273_v44, %v3146_v27 }
 0x2bf   : > { %v3147_v52 = vadd.f32 %v3109_v1, %v5631_v61 }
 0x2c0   : > { %4188 = vst.msk [vmem:[%s4374_s19 + $0x38] sm:$0xff] %vm2203_vm9, %v3668_v43  ;;  %v3464_v12 = vadd.f32 %v3424_v63, %v3313_v22 }
 0x2c1   : > { %v3430_v57 = vpop.f32.mrf.mxu0 }
 0x2c2   : > { %v3631_v40 = vadd.f32 %v3591_v4, %v3464_v12 }
 0x2c4   : > { %v3653_v51 = vadd.f32 %v5747_v25, %v3631_v40 }
 0x2c5   : > { %v3276_v38 = vpop.f32.mrf.mxu3  ;;  %v3597_v53 = vpop.f32.mrf.mxu1 }
 0x2c6   : > { %v3112_v47 = vpop.f32.mrf.mxu2  ;;  %v3669_v34 = vmax.f32 %v3653_v51, 0.0  ;;  %v3314_v56 = vadd.f32 %v3276_v38, %v3147_v52 }
 0x2c7   : > { %v3148_v18 = vadd.f32 %v3112_v47, %v5641_v20 }
 0x2c8   : > { %4189 = vst.msk [vmem:[%s4374_s19 + $0x50] sm:$0xff] %vm2203_vm9, %v3669_v34  ;;  %v3465_v32 = vadd.f32 %v3427_v54, %v3314_v56 }
 0x2c9   : > { %v3433_v13 = vpop.f32.mrf.mxu0 }
 0x2ca   : > { %v3632_v46 = vadd.f32 %v3594_v48, %v3465_v32 }
 0x2cc   : > { %v3654_v62 = vadd.f32 %v5747_v25, %v3632_v46 }
 0x2cd   : > { %v3279_v61 = vpop.f32.mrf.mxu3  ;;  %v3600_v29 = vpop.f32.mrf.mxu1 }
 0x2ce   : > { %v3115_v37 = vpop.f32.mrf.mxu2  ;;  %v3670_v6 = vmax.f32 %v3654_v62, 0.0  ;;  %v3315_v58 = vadd.f32 %v3279_v61, %v3148_v18 }
 0x2cf   : > { %v3149_v8 = vadd.f32 %v3115_v37, %v5657_v26 }
 0x2d0   : > { %4190 = vst.msk [vmem:[%s4374_s19 + $0x58] sm:$0xff] %vm2203_vm9, %v3670_v6  ;;  %v3466_v3 = vadd.f32 %v3430_v57, %v3315_v58 }
 0x2d1   : > { %v3436_v60 = vpop.f32.mrf.mxu0 }
 0x2d2   : > { %v3633_v31 = vadd.f32 %v3597_v53, %v3466_v3 }
 0x2d4   : > { %v3655_v59 = vadd.f32 %v5747_v25, %v3633_v31 }
 0x2d5   : > { %v3282_v20 = vpop.f32.mrf.mxu3  ;;  %v3603_v50 = vpop.f32.mrf.mxu1 }
 0x2d6   : > { %v3118_v2 = vpop.f32.mrf.mxu2  ;;  %v3671_v9 = vmax.f32 %v3655_v59, 0.0  ;;  %v3316_v15 = vadd.f32 %v3282_v20, %v3149_v8 }
 0x2d7   : > { %v3150_v5 = vadd.f32 %v3118_v2, %v5667_v55 }
 0x2d8   : > { %4191 = vst.msk [vmem:[%s4374_s19 + $0x70] sm:$0xff] %vm2203_vm9, %v3671_v9  ;;  %v3467_v45 = vadd.f32 %v3433_v13, %v3316_v15 }
 0x2d9   : > { %v3439_v24 = vpop.f32.mrf.mxu0 }
 0x2da   : > { %v3634_v19 = vadd.f32 %v3600_v29, %v3467_v45 }
 0x2dc   : > { %v3656_v23 = vadd.f32 %v5747_v25, %v3634_v19 }
 0x2dd   : > { %v3285_v26 = vpop.f32.mrf.mxu3  ;;  %v3606_v28 = vpop.f32.mrf.mxu1 }
 0x2de   : > { %v3121_v63 = vpop.f32.mrf.mxu2  ;;  %v3672_v21 = vmax.f32 %v3656_v23, 0.0  ;;  %v3317_v30 = vadd.f32 %v3285_v26, %v3150_v5 }
 0x2df   : > { %v3151_v17 = vadd.f32 %v3121_v63, %v5683_v36 }
 0x2e0   : > { %4192 = vst.msk [vmem:[%s4374_s19 + $0x78] sm:$0xff] %vm2203_vm9, %v3672_v21  ;;  %v3468_v33 = vadd.f32 %v3436_v60, %v3317_v30 }
 0x2e1   : > { %v3442_v41 = vpop.f32.mrf.mxu0 }
 0x2e2   : > { %v3635_v14 = vadd.f32 %v3603_v50, %v3468_v33 }
 0x2e4   : > { %v3657_v4 = vadd.f32 %v5747_v25, %v3635_v14 }
 0x2e5   : > { %v3288_v55 = vpop.f32.mrf.mxu3  ;;  %v3609_v27 = vpop.f32.mrf.mxu1 }
 0x2e6   : > { %v3124_v39 = vpop.f32.mrf.mxu2  ;;  %v3673_v54 = vmax.f32 %v3657_v4, 0.0  ;;  %v3318_v11 = vadd.f32 %v3288_v55, %v3151_v17 }
 0x2e7   : > { %v3152_v44 = vadd.f32 %v3124_v39, %v5693_v7 }
 0x2e8   : > { %4193 = vst.msk [vmem:[%s4374_s19 + $0x90] sm:$0xff] %vm2203_vm9, %v3673_v54  ;;  %v3469_v0 = vadd.f32 %v3439_v24, %v3318_v11 }
 0x2e9   : > { %v3445_v22 = vpop.f32.mrf.mxu0 }
 0x2ea   : > { %v3636_v1 = vadd.f32 %v3606_v28, %v3469_v0 }
 0x2ec   : > { %v3658_v43 = vadd.f32 %v5747_v25, %v3636_v1 }
 0x2ed   : > { %v3291_v36 = vpop.f32.mrf.mxu3  ;;  %v3612_v40 = vpop.f32.mrf.mxu1 }
 0x2ee   : > { %v3127_v48 = vpop.f32.mrf.mxu2  ;;  %v3674_v12 = vmax.f32 %v3658_v43, 0.0  ;;  %v3319_v57 = vadd.f32 %v3291_v36, %v3152_v44 }
 0x2ef   : > { %v3153_v47 = vadd.f32 %v3127_v48, %v5709_v49 }
 0x2f0   : > { %4194 = vst.msk [vmem:[%s4374_s19 + $0x98] sm:$0xff] %vm2203_vm9, %v3674_v12  ;;  %v3470_v52 = vadd.f32 %v3442_v41, %v3319_v57 }
 0x2f1   : > { %v3448_v32 = vpop.f32.mrf.mxu0 }
 0x2f2   : > { %v3637_v51 = vadd.f32 %v3609_v27, %v3470_v52 }
 0x2f4   : > { %v3659_v38 = vadd.f32 %v5747_v25, %v3637_v51 }
 0x2f5   : > { %v3294_v7 = vpop.f32.mrf.mxu3  ;;  %v3615_v46 = vpop.f32.mrf.mxu1 }
 0x2f6   : > { %v3130_v34 = vpop.f32.mrf.mxu2  ;;  %v3675_v56 = vmax.f32 %v3659_v38, 0.0  ;;  %v3320_v53 = vadd.f32 %v3294_v7, %v3153_v47 }
 0x2f7   : > { %v3154_v62 = vadd.f32 %v3130_v34, %v5719_v35 }
 0x2f8   : > { %4195 = vst.msk [vmem:[%s4374_s19 + $0xb0] sm:$0xff] %vm2203_vm9, %v3675_v56  ;;  %v3471_v13 = vadd.f32 %v3445_v22, %v3320_v53 }
 0x2f9   : > { %v3451_v3 = vpop.f32.mrf.mxu0 }
 0x2fa   : > { %v3638_v18 = vadd.f32 %v3612_v40, %v3471_v13 }
 0x2fc   : > { %v3660_v37 = vadd.f32 %v5747_v25, %v3638_v18 }
 0x2fd   : > { %v3297_v49 = vpop.f32.mrf.mxu3  ;;  %v3618_v31 = vpop.f32.mrf.mxu1 }
 0x2fe   : > { %v3133_v61 = vpop.f32.mrf.mxu2  ;;  %v3676_v6 = vmax.f32 %v3660_v37, 0.0  ;;  %v3321_v58 = vadd.f32 %v3297_v49, %v3154_v62 }
 0x2ff   : > { %v3155_v8 = vadd.f32 %v3133_v61, %v5731_v10 }
 0x300   : > { %4196 = vst.msk [vmem:[%s4374_s19 + $0xb8] sm:$0xff] %vm2203_vm9, %v3676_v6  ;;  %v3472_v29 = vadd.f32 %v3448_v32, %v3321_v58 }
 0x301   : > { %v3454_v45 = vpop.f32.mrf.mxu0 }
 0x302   : > { %v3639_v60 = vadd.f32 %v3615_v46, %v3472_v29 }
 0x304   : > { %v3661_v59 = vadd.f32 %v5747_v25, %v3639_v60 }
 0x305   : > { %v3300_v2 = vpop.f32.mrf.mxu3  ;;  %v3621_v23 = vpop.f32.mrf.mxu1 }
 0x306   : > { %v3677_v35 = vmax.f32 %v3661_v59, 0.0  ;;  %v3322_v20 = vadd.f32 %v3300_v2, %v3155_v8  ;;  %v3136_v9 = vpop.f32.mrf.mxu2 }
 0x307   : > { %v3156_v24 = vadd.f32 %v3136_v9, %v5740_v16 }
 0x308   : > { %4197 = vst.msk [vmem:[%s4374_s19 + $0xd0] sm:$0xff] %vm2203_vm9, %v3677_v35  ;;  %v3473_v15 = vadd.f32 %v3451_v3, %v3322_v20 }
 0x309   : > { %v3457_v41 = vpop.f32.mrf.mxu0 }
 0x30a   : > { %v3640_v50 = vadd.f32 %v3618_v31, %v3473_v15 }
 0x30c   : > { %v3662_v19 = vadd.f32 %v5747_v25, %v3640_v50 }
 0x30d   : > { %v3303_v5 = vpop.f32.mrf.mxu3  ;;  %v3624_v4 = vpop.f32.mrf.mxu1 }
 0x30e   : > { %v3678_v10 = vmax.f32 %v3662_v19, 0.0  ;;  %v3323_v63 = vadd.f32 %v3303_v5, %v3156_v24  ;;  %v3139_v21 = vpop.f32.mrf.mxu2 }
 0x30f   : > { %v3157_v28 = vadd.f32 %v3139_v21, %v5744_v42 }
 0x310   : > { %4198 = vst.msk [vmem:[%s4374_s19 + $0xd8] sm:$0xff] %vm2203_vm9, %v3678_v10  ;;  %v3474_v26 = vadd.f32 %v3454_v45, %v3323_v63 }
 0x312   : > { %v3641_v30 = vadd.f32 %v3621_v23, %v3474_v26 }
 0x314   : > { %v3663_v33 = vadd.f32 %v5747_v25, %v3641_v30 }
 0x315   : > { %v3306_v14 = vpop.f32.mrf.mxu3 }
 0x316   : > { %v3679_v16 = vmax.f32 %v3663_v33, 0.0  ;;  %v3324_v17 = vadd.f32 %v3306_v14, %v3157_v28 }
 0x318   : > { %4199 = vst.msk [vmem:[%s4374_s19 + $0xf0] sm:$0xff] %vm2203_vm9, %v3679_v16  ;;  %v3475_v39 = vadd.f32 %v3457_v41, %v3324_v17 }
 0x31a   : > { %v3642_v55 = vadd.f32 %v3624_v4, %v3475_v39 }
 0x31c   : > { %v3664_v54 = vadd.f32 %v5747_v25, %v3642_v55 }
 0x31e   : > { %v3680_v11 = vmax.f32 %v3664_v54, 0.0 }
 0x320   : > { %4200 = vst.msk [vmem:[%s4374_s19 + $0xf8] sm:$0xff] %vm2203_vm9, %v3680_v11 }
 0x321 PF: > { %s15_s22 = sadd.s32 1, %s4290_s22   ;;  %s6027_s19 = sld [smem:[#allocation3_spill]] }
 0x322   : > { %p12_p0 = scmp.ge.s32.totalorder %s15_s22, 6   ;;  %s6028_s26 = sld [smem:[#allocation4_spill]] }
 0x323   : > { %s6029_s21 = sld [smem:[#allocation5_spill]]  ;;  %s6030_s18 = smov %s4282_s20 }
 0x324   :  { %14 = sbr.rel (!%p12_p0) target bundleno = 3 (0x3), region = 93 }
 0x328   : > { %s6031_s20 = smov %s6028_s26 }

</bundles_post_ra>
